<compile_context>
chip_gen: v5e
topology: v5e:2x2
jax: 0.10.0
libtpu: 0.0.40
codegen_flags: <defaults>
</compile_context>

<pallas_src>
import functools

import jax
import jax.numpy as jnp
import numpy as np
from jax import lax
from jax.experimental import pallas as pl
from jax.experimental.pallas import tpu as pltpu  # noqa: F401  (kept for TPU-specific params if scaled up)

# ----------------------------- model config ---------------------------------
D_MODEL = 32
FFN_HIDDEN = 64
NUM_HEADS = 4
NUM_LAYERS = 2
DROP_PROB = 0.0          # dropout is identity in this forward pass
BATCH = 2
SEQ = 8
LN_EPS = 1e-5

HEAD_DIM = D_MODEL // NUM_HEADS
WIDE = 2 * D_MODEL + NUM_HEADS * D_MODEL          # 192 = [Q(32) | K(32) | VO_0..3 (4*32)]
W_ROWS_PER_LAYER = D_MODEL + D_MODEL + FFN_HIDDEN  # wcat(32) + w1(32) + w2(64) = 128 rows
B_ROWS_PER_LAYER = 8                               # 7 bias/LN rows + 1 pad row


# ------------------------------- kernel -------------------------------------
def _encoder_kernel(x_ref, pw_ref, pb_ref, o_ref, *, num_heads, num_layers):
    B, S, D = x_ref.shape
    hd = D // num_heads
    wide = pw_ref.shape[1]
    ffn = FFN_HIDDEN
    bf16 = jnp.bfloat16

    # Collapse (B, S) -> rows; only leading dims change (layout-free).
    h = x_ref[...].reshape(B * S, D)                       # (BS, D) f32

    def layer_norm(r, g, b):
        m = jnp.mean(r, axis=-1, keepdims=True)
        v = jnp.mean((r - m) ** 2, axis=-1, keepdims=True)
        return g * (r - m) * lax.rsqrt(v + LN_EPS) + b

    for l in range(num_layers):                            # unrolled (2 layers)
        wbase = l * W_ROWS_PER_LAYER
        bbase = l * B_ROWS_PER_LAYER

        # Static, sublane-aligned slices of the two packed parameter slabs.
        wcat = pw_ref[wbase:wbase + D, :]                          # (D, 192) bf16
        w1 = pw_ref[wbase + D:wbase + 2 * D, :ffn]                 # (D, ffn) bf16
        w2 = pw_ref[wbase + 2 * D:wbase + 2 * D + ffn, :D]         # (ffn, D) bf16
        bcat = pb_ref[bbase + 0:bbase + 1, :]                      # (1, 192) f32
        g1 = pb_ref[bbase + 1:bbase + 2, :D]
        be1 = pb_ref[bbase + 2:bbase + 3, :D]
        b1 = pb_ref[bbase + 3:bbase + 4, :ffn]
        b2 = pb_ref[bbase + 4:bbase + 5, :D]
        g2 = pb_ref[bbase + 5:bbase + 6, :D]
        be2 = pb_ref[bbase + 6:bbase + 7, :D]

        # ---- multi-head self-attention (mask=False) ----
        # Single wide projection: [Q*scale | K | X@Wv_h@Wo_h per head] + bias.
        qkvo = jnp.dot(h.astype(bf16), wcat,
                       preferred_element_type=jnp.float32) + bcat  # (BS, 192) f32
        qkvo = qkvo.reshape(B, S, wide)                            # leading-dim reshape

        attn = None
        for hh in range(num_heads):
            q = qkvo[:, :, hh * hd:(hh + 1) * hd].astype(bf16)              # (B,S,hd)
            k = qkvo[:, :, D + hh * hd:D + (hh + 1) * hd].astype(bf16)      # (B,S,hd)
            vo = qkvo[:, :, 2 * D + hh * D:2 * D + (hh + 1) * D].astype(bf16)  # (B,S,D)
            # scale already folded into the Q columns host-side
            s = jnp.einsum('bqd,bkd->bqk', q, k,
                           preferred_element_type=jnp.float32)
            s = s - jnp.max(s, axis=-1, keepdims=True)
            p = jnp.exp(s)
            p = p * pl.reciprocal(jnp.sum(p, axis=-1, keepdims=True),
                                  approx=True)
            # Wo is folded into vo, so this accumulates the projected output.
            contrib = jnp.einsum('bqk,bkd->bqd', p.astype(bf16), vo,
                                 preferred_element_type=jnp.float32)        # (B,S,D)
            attn = contrib if attn is None else attn + contrib

        # ---- dropout1 (identity) + residual + LayerNorm 1 ----
        h = layer_norm(h + attn.reshape(B * S, D), g1, be1)

        # ---- position-wise feed-forward ----
        f = jnp.dot(h.astype(bf16), w1, preferred_element_type=jnp.float32) + b1
        f = jnp.maximum(f, 0.0)                            # ReLU
        f = jnp.dot(f.astype(bf16), w2, preferred_element_type=jnp.float32) + b2

        # ---- dropout2 (identity) + residual + LayerNorm 2 ----
        h = layer_norm(h + f, g2, be2)

    o_ref[...] = h.reshape(B, S, D).astype(o_ref.dtype)


def encoder_pallas(x, pw, pb):
    """Full Encoder forward in ONE pallas_call. x: (B, S, D)."""
    B, S, D = x.shape
    kernel = functools.partial(_encoder_kernel, num_heads=NUM_HEADS,
                               num_layers=NUM_LAYERS)
    # No grid: single program; x + 2 packed parameter slabs = 3 input DMAs.
    return pl.pallas_call(
        kernel,
        out_shape=jax.ShapeDtypeStruct((B, S, D), x.dtype),
    )(x, pw, pb)


# ------------------------ host-side parameter packing ------------------------
def pack_params(layer_params):
    """Pack per-layer params into (pw: bf16 weight slab, pb: f32 vector slab).

    Per layer:
      pw rows [0:32)   = [Wq*scale | Wk | Wv_0@Wo_0 | ... | Wv_3@Wo_3]  (32,192)
      pw rows [32:64)  = W1 (32,64), zero-padded to 192 lanes
      pw rows [64:128) = W2 (64,32), zero-padded to 192 lanes
      pb row 0 = [bq*scale | bk | bvo_0 + bo | bvo_1..3], rows 1..6 = LN/FFN vectors.
    """
    H, hd = NUM_HEADS, HEAD_DIM
    scale = 1.0 / np.sqrt(hd)

    def pad_w(a):
        return jnp.pad(a, ((0, 0), (0, WIDE - a.shape[1])))

    def row(a):
        a = jnp.asarray(a, jnp.float32).reshape(1, -1)
        return jnp.pad(a, ((0, 0), (0, WIDE - a.shape[1])))

    w_blocks, b_blocks = [], []
    for (wqkv, bqkv, wo, bo, g1, be1, w1, b1, w2, b2, g2, be2) in layer_params:
        # qkv columns are per-head contiguous [q_h | k_h | v_h] chunks.
        wqkv_h = wqkv.reshape(D_MODEL, H, 3 * hd)
        bqkv_h = bqkv.reshape(1, H, 3 * hd)
        wq = wqkv_h[:, :, :hd].reshape(D_MODEL, D_MODEL) * scale
        wk = wqkv_h[:, :, hd:2 * hd].reshape(D_MODEL, D_MODEL)
        bq = bqkv_h[:, :, :hd].reshape(1, D_MODEL) * scale
        bk = bqkv_h[:, :, hd:2 * hd].reshape(1, D_MODEL)
        wvo, bvo = [], []
        for h in range(H):
            wo_h = wo[h * hd:(h + 1) * hd, :]                  # (hd, D)
            wvo.append(wqkv_h[:, h, 2 * hd:] @ wo_h)           # (D, D)
            bvo.append(bqkv_h[:, h, 2 * hd:] @ wo_h)           # (1, D)
        # Fold the output-projection bias into head 0 (exact: softmax rows sum to 1).
        bvo[0] = bvo[0] + bo
        wcat = jnp.concatenate([wq, wk] + wvo, axis=1)         # (D, 192)
        bcat = jnp.concatenate([bq, bk] + bvo, axis=1)         # (1, 192)

        w_blocks.append(jnp.concatenate([pad_w(wcat), pad_w(w1), pad_w(w2)],
                                        axis=0))               # (128, 192)
        b_blocks.append(jnp.concatenate(
            [row(bcat), row(g1), row(be1), row(b1), row(b2), row(g2), row(be2),
             jnp.zeros((1, WIDE), jnp.float32)], axis=0))       # (8, 192)

    pw = jnp.concatenate(w_blocks, axis=0).astype(jnp.bfloat16)  # (L*128, 192)
    pb = jnp.concatenate(b_blocks, axis=0).astype(jnp.float32)   # (L*8, 192)
    return pw, pb


# -------------------------- pure-JAX reference -------------------------------
def encoder_layer_ref(x, params):
    (wqkv, bqkv, wo, bo, g1, be1, w1, b1, w2, b2, g2, be2) = params
    B, S, D = x.shape
    hd = D // NUM_HEADS
    qkv = x @ wqkv + bqkv                                  # (B, S, 3D)
    qkv = qkv.reshape(B, S, NUM_HEADS, 3 * hd).transpose(0, 2, 1, 3)
    q, k, v = qkv[..., :hd], qkv[..., hd:2 * hd], qkv[..., 2 * hd:]
    s = jnp.einsum("bhqd,bhkd->bhqk", q, k) / jnp.sqrt(jnp.float32(hd))
    p = jax.nn.softmax(s, axis=-1)
    attn = jnp.einsum("bhqk,bhkd->bhqd", p, v).transpose(0, 2, 1, 3).reshape(B, S, D)
    attn_out = attn @ wo + bo

    def ln(h, g, b):
        m = jnp.mean(h, axis=-1, keepdims=True)
        var = jnp.mean((h - m) ** 2, axis=-1, keepdims=True)
        return g * (h - m) / jnp.sqrt(var + LN_EPS) + b

    h1 = ln(x + attn_out, g1, be1)
    f = jnp.maximum(h1 @ w1 + b1, 0.0) @ w2 + b2
    return ln(h1 + f, g2, be2)


def encoder_ref(x, layer_params):
    for params in layer_params:
        x = encoder_layer_ref(x, params)
    return x


# ------------------------------ param init ----------------------------------
def init_layer_params(key, d_model, ffn_hidden):
    ks = jax.random.split(key, 10)
    f32 = jnp.float32
    wqkv = jax.random.normal(ks[0], (d_model, 3 * d_model), f32) * 0.05
    bqkv = jax.random.normal(ks[1], (1, 3 * d_model), f32) * 0.02
    wo = jax.random.normal(ks[2], (d_model, d_model), f32) * 0.05
    bo = jax.random.normal(ks[3], (1, d_model), f32) * 0.02
    g1 = 1.0 + jax.random.normal(ks[4], (1, d_model), f32) * 0.02
    be1 = jax.random.normal(ks[5], (1, d_model), f32) * 0.02
    w1 = jax.random.normal(ks[6], (d_model, ffn_hidden), f32) * 0.05
    b1 = jax.random.normal(ks[7], (1, ffn_hidden), f32) * 0.02
    w2 = jax.random.normal(ks[8], (ffn_hidden, d_model), f32) * 0.05
    b2 = jax.random.normal(ks[9], (1, d_model), f32) * 0.02
    g2 = jnp.ones((1, d_model), f32)
    be2 = jnp.zeros((1, d_model), f32)
    return (wqkv, bqkv, wo, bo, g1, be1, w1, b1, w2, b2, g2, be2)


# --------------------------------- main --------------------------------------
if __name__ == "__main__":
    key = jax.random.PRNGKey(0)
    key, xkey = jax.random.split(key)
    x = jax.random.normal(xkey, (BATCH, SEQ, D_MODEL), jnp.float32)

    layer_keys = jax.random.split(key, NUM_LAYERS)
    layer_params = [init_layer_params(k, D_MODEL, FFN_HIDDEN) for k in layer_keys]

    pw, pb = pack_params(layer_params)

    out = jax.block_until_ready(encoder_pallas(x, pw, pb))
    ref = jax.block_until_ready(encoder_ref(x, layer_params))

    # Tolerance accounts for bf16 MXU operands (f32 accumulation) and the
    # approximate (EUP) softmax reciprocal.
    np.testing.assert_allclose(np.asarray(out), np.asarray(ref),
                               rtol=1e-2, atol=1e-2)

    assert out.shape == (BATCH, SEQ, D_MODEL)
    print("KERNEL_OK")
</pallas_src>

<mosaic_0001>
module attributes {stable_mosaic.version = 11 : i64} {
  func.func @_encoder_kernel(%arg0: memref<2x8x32xf32, #tpu.memory_space<vmem>>, %arg1: memref<256x192xbf16, #tpu.memory_space<vmem>>, %arg2: memref<16x192xf32, #tpu.memory_space<vmem>>, %arg3: memref<2x8x32xf32, #tpu.memory_space<vmem>>) attributes {dimension_semantics = [], scalar_prefetch = 0 : i64, scratch_operands = 0 : i64, tpu.core_type = #tpu.core_type<tc>} {
    %c0 = arith.constant 0 : index
    %c0_0 = arith.constant 0 : index
    %c0_1 = arith.constant 0 : index
    %0 = vector.load %arg0[%c0, %c0_0, %c0_1] : memref<2x8x32xf32, #tpu.memory_space<vmem>>, vector<2x8x32xf32>
    %1 = vector.shape_cast %0 : vector<2x8x32xf32> to vector<16x32xf32>
    %c0_2 = arith.constant 0 : index
    %c0_3 = arith.constant 0 : index
    %2 = vector.load %arg1[%c0_2, %c0_3] : memref<256x192xbf16, #tpu.memory_space<vmem>>, vector<32x192xbf16>
    %c32 = arith.constant 32 : index
    %c0_4 = arith.constant 0 : index
    %3 = vector.load %arg1[%c32, %c0_4] : memref<256x192xbf16, #tpu.memory_space<vmem>>, vector<32x64xbf16>
    %c64 = arith.constant 64 : index
    %c0_5 = arith.constant 0 : index
    %4 = vector.load %arg1[%c64, %c0_5] : memref<256x192xbf16, #tpu.memory_space<vmem>>, vector<64x32xbf16>
    %c0_6 = arith.constant 0 : index
    %c0_7 = arith.constant 0 : index
    %5 = vector.load %arg2[%c0_6, %c0_7] : memref<16x192xf32, #tpu.memory_space<vmem>>, vector<1x192xf32>
    %c1 = arith.constant 1 : index
    %c0_8 = arith.constant 0 : index
    %6 = vector.load %arg2[%c1, %c0_8] : memref<16x192xf32, #tpu.memory_space<vmem>>, vector<1x32xf32>
    %c2 = arith.constant 2 : index
    %c0_9 = arith.constant 0 : index
    %7 = vector.load %arg2[%c2, %c0_9] : memref<16x192xf32, #tpu.memory_space<vmem>>, vector<1x32xf32>
    %c3 = arith.constant 3 : index
    %c0_10 = arith.constant 0 : index
    %8 = vector.load %arg2[%c3, %c0_10] : memref<16x192xf32, #tpu.memory_space<vmem>>, vector<1x64xf32>
    %c4 = arith.constant 4 : index
    %c0_11 = arith.constant 0 : index
    %9 = vector.load %arg2[%c4, %c0_11] : memref<16x192xf32, #tpu.memory_space<vmem>>, vector<1x32xf32>
    %c5 = arith.constant 5 : index
    %c0_12 = arith.constant 0 : index
    %10 = vector.load %arg2[%c5, %c0_12] : memref<16x192xf32, #tpu.memory_space<vmem>>, vector<1x32xf32>
    %c6 = arith.constant 6 : index
    %c0_13 = arith.constant 0 : index
    %11 = vector.load %arg2[%c6, %c0_13] : memref<16x192xf32, #tpu.memory_space<vmem>>, vector<1x32xf32>
    %12 = arith.truncf %1 : vector<16x32xf32> to vector<16x32xbf16>
    %cst = arith.constant dense<0.000000e+00> : vector<16x192xf32>
    %13 = tpu.matmul %12, %2, %cst {dimension_numbers = #tpu.dot_dimension_numbers<[1], [0], [0], [1], [0, 0, 1, 1], [], []>} : vector<16x32xbf16>, vector<32x192xbf16>, vector<16x192xf32> -> vector<16x192xf32>
    %14 = vector.broadcast %5 : vector<1x192xf32> to vector<16x192xf32>
    %15 = arith.addf %13, %14 : vector<16x192xf32>
    %16 = vector.shape_cast %15 : vector<16x192xf32> to vector<2x8x192xf32>
    %17 = vector.extract_strided_slice %16 {offsets = [0, 0, 0], sizes = [2, 8, 8], strides = [1, 1, 1]} : vector<2x8x192xf32> to vector<2x8x8xf32>
    %18 = arith.truncf %17 : vector<2x8x8xf32> to vector<2x8x8xbf16>
    %19 = vector.extract_strided_slice %16 {offsets = [0, 0, 32], sizes = [2, 8, 8], strides = [1, 1, 1]} : vector<2x8x192xf32> to vector<2x8x8xf32>
    %20 = arith.truncf %19 : vector<2x8x8xf32> to vector<2x8x8xbf16>
    %21 = vector.extract_strided_slice %16 {offsets = [0, 0, 64], sizes = [2, 8, 32], strides = [1, 1, 1]} : vector<2x8x192xf32> to vector<2x8x32xf32>
    %22 = arith.truncf %21 : vector<2x8x32xf32> to vector<2x8x32xbf16>
    "tpu.trace_start"() <{level = 10 : i32, message = "bqd,bkd->bqk"}> : () -> ()
    %cst_14 = arith.constant dense<0.000000e+00> : vector<2x8x8xf32>
    %23 = tpu.matmul %18, %20, %cst_14 {dimension_numbers = #tpu.dot_dimension_numbers<[2], [2], [1], [1], [0, 0, 0, 1, 1, 1], [0], [0]>} : vector<2x8x8xbf16>, vector<2x8x8xbf16>, vector<2x8x8xf32> -> vector<2x8x8xf32>
    "tpu.trace_stop"() : () -> ()
    %cst_15 = arith.constant dense<0xFF800000> : vector<2x8xf32>
    %24 = vector.multi_reduction <maximumf>, %23, %cst_15 [2] : vector<2x8x8xf32> to vector<2x8xf32>
    %25 = vector.shape_cast %24 : vector<2x8xf32> to vector<2x8x1xf32>
    %26 = vector.broadcast %25 : vector<2x8x1xf32> to vector<2x8x8xf32>
    %27 = arith.subf %23, %26 : vector<2x8x8xf32>
    %28 = math.exp %27 : vector<2x8x8xf32>
    %cst_16 = arith.constant dense<0.000000e+00> : vector<2x8xf32>
    %29 = vector.multi_reduction <add>, %28, %cst_16 [2] : vector<2x8x8xf32> to vector<2x8xf32>
    %30 = vector.shape_cast %29 : vector<2x8xf32> to vector<2x8x1xf32>
    %31 = tpu.reciprocal %30 {approx = true} : vector<2x8x1xf32> -> vector<2x8x1xf32>
    %32 = vector.broadcast %31 : vector<2x8x1xf32> to vector<2x8x8xf32>
    %33 = arith.mulf %28, %32 : vector<2x8x8xf32>
    %34 = arith.truncf %33 : vector<2x8x8xf32> to vector<2x8x8xbf16>
    "tpu.trace_start"() <{level = 10 : i32, message = "bqk,bkd->bqd"}> : () -> ()
    %cst_17 = arith.constant dense<0.000000e+00> : vector<2x8x32xf32>
    %35 = tpu.matmul %34, %22, %cst_17 {dimension_numbers = #tpu.dot_dimension_numbers<[2], [1], [1], [2], [0, 0, 0, 1, 1, 2], [0], [0]>} : vector<2x8x8xbf16>, vector<2x8x32xbf16>, vector<2x8x32xf32> -> vector<2x8x32xf32>
    "tpu.trace_stop"() : () -> ()
    %36 = vector.extract_strided_slice %16 {offsets = [0, 0, 8], sizes = [2, 8, 8], strides = [1, 1, 1]} : vector<2x8x192xf32> to vector<2x8x8xf32>
    %37 = arith.truncf %36 : vector<2x8x8xf32> to vector<2x8x8xbf16>
    %38 = vector.extract_strided_slice %16 {offsets = [0, 0, 40], sizes = [2, 8, 8], strides = [1, 1, 1]} : vector<2x8x192xf32> to vector<2x8x8xf32>
    %39 = arith.truncf %38 : vector<2x8x8xf32> to vector<2x8x8xbf16>
    %40 = vector.extract_strided_slice %16 {offsets = [0, 0, 96], sizes = [2, 8, 32], strides = [1, 1, 1]} : vector<2x8x192xf32> to vector<2x8x32xf32>
    %41 = arith.truncf %40 : vector<2x8x32xf32> to vector<2x8x32xbf16>
    "tpu.trace_start"() <{level = 10 : i32, message = "bqd,bkd->bqk"}> : () -> ()
    %cst_18 = arith.constant dense<0.000000e+00> : vector<2x8x8xf32>
    %42 = tpu.matmul %37, %39, %cst_18 {dimension_numbers = #tpu.dot_dimension_numbers<[2], [2], [1], [1], [0, 0, 0, 1, 1, 1], [0], [0]>} : vector<2x8x8xbf16>, vector<2x8x8xbf16>, vector<2x8x8xf32> -> vector<2x8x8xf32>
    "tpu.trace_stop"() : () -> ()
    %cst_19 = arith.constant dense<0xFF800000> : vector<2x8xf32>
    %43 = vector.multi_reduction <maximumf>, %42, %cst_19 [2] : vector<2x8x8xf32> to vector<2x8xf32>
    %44 = vector.shape_cast %43 : vector<2x8xf32> to vector<2x8x1xf32>
    %45 = vector.broadcast %44 : vector<2x8x1xf32> to vector<2x8x8xf32>
    %46 = arith.subf %42, %45 : vector<2x8x8xf32>
    %47 = math.exp %46 : vector<2x8x8xf32>
    %cst_20 = arith.constant dense<0.000000e+00> : vector<2x8xf32>
    %48 = vector.multi_reduction <add>, %47, %cst_20 [2] : vector<2x8x8xf32> to vector<2x8xf32>
    %49 = vector.shape_cast %48 : vector<2x8xf32> to vector<2x8x1xf32>
    %50 = tpu.reciprocal %49 {approx = true} : vector<2x8x1xf32> -> vector<2x8x1xf32>
    %51 = vector.broadcast %50 : vector<2x8x1xf32> to vector<2x8x8xf32>
    %52 = arith.mulf %47, %51 : vector<2x8x8xf32>
    %53 = arith.truncf %52 : vector<2x8x8xf32> to vector<2x8x8xbf16>
    "tpu.trace_start"() <{level = 10 : i32, message = "bqk,bkd->bqd"}> : () -> ()
    %cst_21 = arith.constant dense<0.000000e+00> : vector<2x8x32xf32>
    %54 = tpu.matmul %53, %41, %cst_21 {dimension_numbers = #tpu.dot_dimension_numbers<[2], [1], [1], [2], [0, 0, 0, 1, 1, 2], [0], [0]>} : vector<2x8x8xbf16>, vector<2x8x32xbf16>, vector<2x8x32xf32> -> vector<2x8x32xf32>
    "tpu.trace_stop"() : () -> ()
    %55 = arith.addf %35, %54 : vector<2x8x32xf32>
    %56 = vector.extract_strided_slice %16 {offsets = [0, 0, 16], sizes = [2, 8, 8], strides = [1, 1, 1]} : vector<2x8x192xf32> to vector<2x8x8xf32>
    %57 = arith.truncf %56 : vector<2x8x8xf32> to vector<2x8x8xbf16>
    %58 = vector.extract_strided_slice %16 {offsets = [0, 0, 48], sizes = [2, 8, 8], strides = [1, 1, 1]} : vector<2x8x192xf32> to vector<2x8x8xf32>
    %59 = arith.truncf %58 : vector<2x8x8xf32> to vector<2x8x8xbf16>
    %60 = vector.extract_strided_slice %16 {offsets = [0, 0, 128], sizes = [2, 8, 32], strides = [1, 1, 1]} : vector<2x8x192xf32> to vector<2x8x32xf32>
    %61 = arith.truncf %60 : vector<2x8x32xf32> to vector<2x8x32xbf16>
    "tpu.trace_start"() <{level = 10 : i32, message = "bqd,bkd->bqk"}> : () -> ()
    %cst_22 = arith.constant dense<0.000000e+00> : vector<2x8x8xf32>
    %62 = tpu.matmul %57, %59, %cst_22 {dimension_numbers = #tpu.dot_dimension_numbers<[2], [2], [1], [1], [0, 0, 0, 1, 1, 1], [0], [0]>} : vector<2x8x8xbf16>, vector<2x8x8xbf16>, vector<2x8x8xf32> -> vector<2x8x8xf32>
    "tpu.trace_stop"() : () -> ()
    %cst_23 = arith.constant dense<0xFF800000> : vector<2x8xf32>
    %63 = vector.multi_reduction <maximumf>, %62, %cst_23 [2] : vector<2x8x8xf32> to vector<2x8xf32>
    %64 = vector.shape_cast %63 : vector<2x8xf32> to vector<2x8x1xf32>
    %65 = vector.broadcast %64 : vector<2x8x1xf32> to vector<2x8x8xf32>
    %66 = arith.subf %62, %65 : vector<2x8x8xf32>
    %67 = math.exp %66 : vector<2x8x8xf32>
    %cst_24 = arith.constant dense<0.000000e+00> : vector<2x8xf32>
    %68 = vector.multi_reduction <add>, %67, %cst_24 [2] : vector<2x8x8xf32> to vector<2x8xf32>
    %69 = vector.shape_cast %68 : vector<2x8xf32> to vector<2x8x1xf32>
    %70 = tpu.reciprocal %69 {approx = true} : vector<2x8x1xf32> -> vector<2x8x1xf32>
    %71 = vector.broadcast %70 : vector<2x8x1xf32> to vector<2x8x8xf32>
    %72 = arith.mulf %67, %71 : vector<2x8x8xf32>
    %73 = arith.truncf %72 : vector<2x8x8xf32> to vector<2x8x8xbf16>
    "tpu.trace_start"() <{level = 10 : i32, message = "bqk,bkd->bqd"}> : () -> ()
    %cst_25 = arith.constant dense<0.000000e+00> : vector<2x8x32xf32>
    %74 = tpu.matmul %73, %61, %cst_25 {dimension_numbers = #tpu.dot_dimension_numbers<[2], [1], [1], [2], [0, 0, 0, 1, 1, 2], [0], [0]>} : vector<2x8x8xbf16>, vector<2x8x32xbf16>, vector<2x8x32xf32> -> vector<2x8x32xf32>
    "tpu.trace_stop"() : () -> ()
    %75 = arith.addf %55, %74 : vector<2x8x32xf32>
    %76 = vector.extract_strided_slice %16 {offsets = [0, 0, 24], sizes = [2, 8, 8], strides = [1, 1, 1]} : vector<2x8x192xf32> to vector<2x8x8xf32>
    %77 = arith.truncf %76 : vector<2x8x8xf32> to vector<2x8x8xbf16>
    %78 = vector.extract_strided_slice %16 {offsets = [0, 0, 56], sizes = [2, 8, 8], strides = [1, 1, 1]} : vector<2x8x192xf32> to vector<2x8x8xf32>
    %79 = arith.truncf %78 : vector<2x8x8xf32> to vector<2x8x8xbf16>
    %80 = vector.extract_strided_slice %16 {offsets = [0, 0, 160], sizes = [2, 8, 32], strides = [1, 1, 1]} : vector<2x8x192xf32> to vector<2x8x32xf32>
    %81 = arith.truncf %80 : vector<2x8x32xf32> to vector<2x8x32xbf16>
    "tpu.trace_start"() <{level = 10 : i32, message = "bqd,bkd->bqk"}> : () -> ()
    %cst_26 = arith.constant dense<0.000000e+00> : vector<2x8x8xf32>
    %82 = tpu.matmul %77, %79, %cst_26 {dimension_numbers = #tpu.dot_dimension_numbers<[2], [2], [1], [1], [0, 0, 0, 1, 1, 1], [0], [0]>} : vector<2x8x8xbf16>, vector<2x8x8xbf16>, vector<2x8x8xf32> -> vector<2x8x8xf32>
    "tpu.trace_stop"() : () -> ()
    %cst_27 = arith.constant dense<0xFF800000> : vector<2x8xf32>
    %83 = vector.multi_reduction <maximumf>, %82, %cst_27 [2] : vector<2x8x8xf32> to vector<2x8xf32>
    %84 = vector.shape_cast %83 : vector<2x8xf32> to vector<2x8x1xf32>
    %85 = vector.broadcast %84 : vector<2x8x1xf32> to vector<2x8x8xf32>
    %86 = arith.subf %82, %85 : vector<2x8x8xf32>
    %87 = math.exp %86 : vector<2x8x8xf32>
    %cst_28 = arith.constant dense<0.000000e+00> : vector<2x8xf32>
    %88 = vector.multi_reduction <add>, %87, %cst_28 [2] : vector<2x8x8xf32> to vector<2x8xf32>
    %89 = vector.shape_cast %88 : vector<2x8xf32> to vector<2x8x1xf32>
    %90 = tpu.reciprocal %89 {approx = true} : vector<2x8x1xf32> -> vector<2x8x1xf32>
    %91 = vector.broadcast %90 : vector<2x8x1xf32> to vector<2x8x8xf32>
    %92 = arith.mulf %87, %91 : vector<2x8x8xf32>
    %93 = arith.truncf %92 : vector<2x8x8xf32> to vector<2x8x8xbf16>
    "tpu.trace_start"() <{level = 10 : i32, message = "bqk,bkd->bqd"}> : () -> ()
    %cst_29 = arith.constant dense<0.000000e+00> : vector<2x8x32xf32>
    %94 = tpu.matmul %93, %81, %cst_29 {dimension_numbers = #tpu.dot_dimension_numbers<[2], [1], [1], [2], [0, 0, 0, 1, 1, 2], [0], [0]>} : vector<2x8x8xbf16>, vector<2x8x32xbf16>, vector<2x8x32xf32> -> vector<2x8x32xf32>
    "tpu.trace_stop"() : () -> ()
    %95 = arith.addf %75, %94 : vector<2x8x32xf32>
    %96 = vector.shape_cast %95 : vector<2x8x32xf32> to vector<16x32xf32>
    %97 = arith.addf %1, %96 : vector<16x32xf32>
    %cst_30 = arith.constant dense<0.000000e+00> : vector<16xf32>
    %98 = vector.multi_reduction <add>, %97, %cst_30 [1] : vector<16x32xf32> to vector<16xf32>
    %99 = vector.shape_cast %98 : vector<16xf32> to vector<16x1xf32>
    %cst_31 = arith.constant 3.200000e+01 : f32
    %100 = vector.broadcast %cst_31 : f32 to vector<16x1xf32>
    %101 = arith.divf %99, %100 : vector<16x1xf32>
    %102 = vector.broadcast %101 : vector<16x1xf32> to vector<16x32xf32>
    %103 = arith.subf %97, %102 : vector<16x32xf32>
    %104 = arith.mulf %103, %103 : vector<16x32xf32>
    %cst_32 = arith.constant dense<0.000000e+00> : vector<16xf32>
    %105 = vector.multi_reduction <add>, %104, %cst_32 [1] : vector<16x32xf32> to vector<16xf32>
    %106 = vector.shape_cast %105 : vector<16xf32> to vector<16x1xf32>
    %cst_33 = arith.constant 3.200000e+01 : f32
    %107 = vector.broadcast %cst_33 : f32 to vector<16x1xf32>
    %108 = arith.divf %106, %107 : vector<16x1xf32>
    %109 = vector.broadcast %101 : vector<16x1xf32> to vector<16x32xf32>
    %110 = arith.subf %97, %109 : vector<16x32xf32>
    %111 = vector.broadcast %6 : vector<1x32xf32> to vector<16x32xf32>
    %112 = arith.mulf %111, %110 : vector<16x32xf32>
    %cst_34 = arith.constant 9.99999974E-6 : f32
    %113 = vector.broadcast %cst_34 : f32 to vector<16x1xf32>
    %114 = arith.addf %108, %113 : vector<16x1xf32>
    %115 = math.rsqrt %114 : vector<16x1xf32>
    %116 = vector.broadcast %115 : vector<16x1xf32> to vector<16x32xf32>
    %117 = arith.mulf %112, %116 : vector<16x32xf32>
    %118 = vector.broadcast %7 : vector<1x32xf32> to vector<16x32xf32>
    %119 = arith.addf %117, %118 : vector<16x32xf32>
    %120 = arith.truncf %119 : vector<16x32xf32> to vector<16x32xbf16>
    %cst_35 = arith.constant dense<0.000000e+00> : vector<16x64xf32>
    %121 = tpu.matmul %120, %3, %cst_35 {dimension_numbers = #tpu.dot_dimension_numbers<[1], [0], [0], [1], [0, 0, 1, 1], [], []>} : vector<16x32xbf16>, vector<32x64xbf16>, vector<16x64xf32> -> vector<16x64xf32>
    %122 = vector.broadcast %8 : vector<1x64xf32> to vector<16x64xf32>
    %123 = arith.addf %121, %122 : vector<16x64xf32>
    %cst_36 = arith.constant 0.000000e+00 : f32
    %124 = vector.broadcast %cst_36 : f32 to vector<16x64xf32>
    %125 = arith.maximumf %123, %124 : vector<16x64xf32>
    %126 = arith.truncf %125 : vector<16x64xf32> to vector<16x64xbf16>
    %cst_37 = arith.constant dense<0.000000e+00> : vector<16x32xf32>
    %127 = tpu.matmul %126, %4, %cst_37 {dimension_numbers = #tpu.dot_dimension_numbers<[1], [0], [0], [1], [0, 0, 1, 1], [], []>} : vector<16x64xbf16>, vector<64x32xbf16>, vector<16x32xf32> -> vector<16x32xf32>
    %128 = vector.broadcast %9 : vector<1x32xf32> to vector<16x32xf32>
    %129 = arith.addf %127, %128 : vector<16x32xf32>
    %130 = arith.addf %119, %129 : vector<16x32xf32>
    %cst_38 = arith.constant dense<0.000000e+00> : vector<16xf32>
    %131 = vector.multi_reduction <add>, %130, %cst_38 [1] : vector<16x32xf32> to vector<16xf32>
    %132 = vector.shape_cast %131 : vector<16xf32> to vector<16x1xf32>
    %cst_39 = arith.constant 3.200000e+01 : f32
    %133 = vector.broadcast %cst_39 : f32 to vector<16x1xf32>
    %134 = arith.divf %132, %133 : vector<16x1xf32>
    %135 = vector.broadcast %134 : vector<16x1xf32> to vector<16x32xf32>
    %136 = arith.subf %130, %135 : vector<16x32xf32>
    %137 = arith.mulf %136, %136 : vector<16x32xf32>
    %cst_40 = arith.constant dense<0.000000e+00> : vector<16xf32>
    %138 = vector.multi_reduction <add>, %137, %cst_40 [1] : vector<16x32xf32> to vector<16xf32>
    %139 = vector.shape_cast %138 : vector<16xf32> to vector<16x1xf32>
    %cst_41 = arith.constant 3.200000e+01 : f32
    %140 = vector.broadcast %cst_41 : f32 to vector<16x1xf32>
    %141 = arith.divf %139, %140 : vector<16x1xf32>
    %142 = vector.broadcast %134 : vector<16x1xf32> to vector<16x32xf32>
    %143 = arith.subf %130, %142 : vector<16x32xf32>
    %144 = vector.broadcast %10 : vector<1x32xf32> to vector<16x32xf32>
    %145 = arith.mulf %144, %143 : vector<16x32xf32>
    %cst_42 = arith.constant 9.99999974E-6 : f32
    %146 = vector.broadcast %cst_42 : f32 to vector<16x1xf32>
    %147 = arith.addf %141, %146 : vector<16x1xf32>
    %148 = math.rsqrt %147 : vector<16x1xf32>
    %149 = vector.broadcast %148 : vector<16x1xf32> to vector<16x32xf32>
    %150 = arith.mulf %145, %149 : vector<16x32xf32>
    %151 = vector.broadcast %11 : vector<1x32xf32> to vector<16x32xf32>
    %152 = arith.addf %150, %151 : vector<16x32xf32>
    %c128 = arith.constant 128 : index
    %c0_43 = arith.constant 0 : index
    %153 = vector.load %arg1[%c128, %c0_43] : memref<256x192xbf16, #tpu.memory_space<vmem>>, vector<32x192xbf16>
    %c160 = arith.constant 160 : index
    %c0_44 = arith.constant 0 : index
    %154 = vector.load %arg1[%c160, %c0_44] : memref<256x192xbf16, #tpu.memory_space<vmem>>, vector<32x64xbf16>
    %c192 = arith.constant 192 : index
    %c0_45 = arith.constant 0 : index
    %155 = vector.load %arg1[%c192, %c0_45] : memref<256x192xbf16, #tpu.memory_space<vmem>>, vector<64x32xbf16>
    %c8 = arith.constant 8 : index
    %c0_46 = arith.constant 0 : index
    %156 = vector.load %arg2[%c8, %c0_46] : memref<16x192xf32, #tpu.memory_space<vmem>>, vector<1x192xf32>
    %c9 = arith.constant 9 : index
    %c0_47 = arith.constant 0 : index
    %157 = vector.load %arg2[%c9, %c0_47] : memref<16x192xf32, #tpu.memory_space<vmem>>, vector<1x32xf32>
    %c10 = arith.constant 10 : index
    %c0_48 = arith.constant 0 : index
    %158 = vector.load %arg2[%c10, %c0_48] : memref<16x192xf32, #tpu.memory_space<vmem>>, vector<1x32xf32>
    %c11 = arith.constant 11 : index
    %c0_49 = arith.constant 0 : index
    %159 = vector.load %arg2[%c11, %c0_49] : memref<16x192xf32, #tpu.memory_space<vmem>>, vector<1x64xf32>
    %c12 = arith.constant 12 : index
    %c0_50 = arith.constant 0 : index
    %160 = vector.load %arg2[%c12, %c0_50] : memref<16x192xf32, #tpu.memory_space<vmem>>, vector<1x32xf32>
    %c13 = arith.constant 13 : index
    %c0_51 = arith.constant 0 : index
    %161 = vector.load %arg2[%c13, %c0_51] : memref<16x192xf32, #tpu.memory_space<vmem>>, vector<1x32xf32>
    %c14 = arith.constant 14 : index
    %c0_52 = arith.constant 0 : index
    %162 = vector.load %arg2[%c14, %c0_52] : memref<16x192xf32, #tpu.memory_space<vmem>>, vector<1x32xf32>
    %163 = arith.truncf %152 : vector<16x32xf32> to vector<16x32xbf16>
    %cst_53 = arith.constant dense<0.000000e+00> : vector<16x192xf32>
    %164 = tpu.matmul %163, %153, %cst_53 {dimension_numbers = #tpu.dot_dimension_numbers<[1], [0], [0], [1], [0, 0, 1, 1], [], []>} : vector<16x32xbf16>, vector<32x192xbf16>, vector<16x192xf32> -> vector<16x192xf32>
    %165 = vector.broadcast %156 : vector<1x192xf32> to vector<16x192xf32>
    %166 = arith.addf %164, %165 : vector<16x192xf32>
    %167 = vector.shape_cast %166 : vector<16x192xf32> to vector<2x8x192xf32>
    %168 = vector.extract_strided_slice %167 {offsets = [0, 0, 0], sizes = [2, 8, 8], strides = [1, 1, 1]} : vector<2x8x192xf32> to vector<2x8x8xf32>
    %169 = arith.truncf %168 : vector<2x8x8xf32> to vector<2x8x8xbf16>
    %170 = vector.extract_strided_slice %167 {offsets = [0, 0, 32], sizes = [2, 8, 8], strides = [1, 1, 1]} : vector<2x8x192xf32> to vector<2x8x8xf32>
    %171 = arith.truncf %170 : vector<2x8x8xf32> to vector<2x8x8xbf16>
    %172 = vector.extract_strided_slice %167 {offsets = [0, 0, 64], sizes = [2, 8, 32], strides = [1, 1, 1]} : vector<2x8x192xf32> to vector<2x8x32xf32>
    %173 = arith.truncf %172 : vector<2x8x32xf32> to vector<2x8x32xbf16>
    "tpu.trace_start"() <{level = 10 : i32, message = "bqd,bkd->bqk"}> : () -> ()
    %cst_54 = arith.constant dense<0.000000e+00> : vector<2x8x8xf32>
    %174 = tpu.matmul %169, %171, %cst_54 {dimension_numbers = #tpu.dot_dimension_numbers<[2], [2], [1], [1], [0, 0, 0, 1, 1, 1], [0], [0]>} : vector<2x8x8xbf16>, vector<2x8x8xbf16>, vector<2x8x8xf32> -> vector<2x8x8xf32>
    "tpu.trace_stop"() : () -> ()
    %cst_55 = arith.constant dense<0xFF800000> : vector<2x8xf32>
    %175 = vector.multi_reduction <maximumf>, %174, %cst_55 [2] : vector<2x8x8xf32> to vector<2x8xf32>
    %176 = vector.shape_cast %175 : vector<2x8xf32> to vector<2x8x1xf32>
    %177 = vector.broadcast %176 : vector<2x8x1xf32> to vector<2x8x8xf32>
    %178 = arith.subf %174, %177 : vector<2x8x8xf32>
    %179 = math.exp %178 : vector<2x8x8xf32>
    %cst_56 = arith.constant dense<0.000000e+00> : vector<2x8xf32>
    %180 = vector.multi_reduction <add>, %179, %cst_56 [2] : vector<2x8x8xf32> to vector<2x8xf32>
    %181 = vector.shape_cast %180 : vector<2x8xf32> to vector<2x8x1xf32>
    %182 = tpu.reciprocal %181 {approx = true} : vector<2x8x1xf32> -> vector<2x8x1xf32>
    %183 = vector.broadcast %182 : vector<2x8x1xf32> to vector<2x8x8xf32>
    %184 = arith.mulf %179, %183 : vector<2x8x8xf32>
    %185 = arith.truncf %184 : vector<2x8x8xf32> to vector<2x8x8xbf16>
    "tpu.trace_start"() <{level = 10 : i32, message = "bqk,bkd->bqd"}> : () -> ()
    %cst_57 = arith.constant dense<0.000000e+00> : vector<2x8x32xf32>
    %186 = tpu.matmul %185, %173, %cst_57 {dimension_numbers = #tpu.dot_dimension_numbers<[2], [1], [1], [2], [0, 0, 0, 1, 1, 2], [0], [0]>} : vector<2x8x8xbf16>, vector<2x8x32xbf16>, vector<2x8x32xf32> -> vector<2x8x32xf32>
    "tpu.trace_stop"() : () -> ()
    %187 = vector.extract_strided_slice %167 {offsets = [0, 0, 8], sizes = [2, 8, 8], strides = [1, 1, 1]} : vector<2x8x192xf32> to vector<2x8x8xf32>
    %188 = arith.truncf %187 : vector<2x8x8xf32> to vector<2x8x8xbf16>
    %189 = vector.extract_strided_slice %167 {offsets = [0, 0, 40], sizes = [2, 8, 8], strides = [1, 1, 1]} : vector<2x8x192xf32> to vector<2x8x8xf32>
    %190 = arith.truncf %189 : vector<2x8x8xf32> to vector<2x8x8xbf16>
    %191 = vector.extract_strided_slice %167 {offsets = [0, 0, 96], sizes = [2, 8, 32], strides = [1, 1, 1]} : vector<2x8x192xf32> to vector<2x8x32xf32>
    %192 = arith.truncf %191 : vector<2x8x32xf32> to vector<2x8x32xbf16>
    "tpu.trace_start"() <{level = 10 : i32, message = "bqd,bkd->bqk"}> : () -> ()
    %cst_58 = arith.constant dense<0.000000e+00> : vector<2x8x8xf32>
    %193 = tpu.matmul %188, %190, %cst_58 {dimension_numbers = #tpu.dot_dimension_numbers<[2], [2], [1], [1], [0, 0, 0, 1, 1, 1], [0], [0]>} : vector<2x8x8xbf16>, vector<2x8x8xbf16>, vector<2x8x8xf32> -> vector<2x8x8xf32>
    "tpu.trace_stop"() : () -> ()
    %cst_59 = arith.constant dense<0xFF800000> : vector<2x8xf32>
    %194 = vector.multi_reduction <maximumf>, %193, %cst_59 [2] : vector<2x8x8xf32> to vector<2x8xf32>
    %195 = vector.shape_cast %194 : vector<2x8xf32> to vector<2x8x1xf32>
    %196 = vector.broadcast %195 : vector<2x8x1xf32> to vector<2x8x8xf32>
    %197 = arith.subf %193, %196 : vector<2x8x8xf32>
    %198 = math.exp %197 : vector<2x8x8xf32>
    %cst_60 = arith.constant dense<0.000000e+00> : vector<2x8xf32>
    %199 = vector.multi_reduction <add>, %198, %cst_60 [2] : vector<2x8x8xf32> to vector<2x8xf32>
    %200 = vector.shape_cast %199 : vector<2x8xf32> to vector<2x8x1xf32>
    %201 = tpu.reciprocal %200 {approx = true} : vector<2x8x1xf32> -> vector<2x8x1xf32>
    %202 = vector.broadcast %201 : vector<2x8x1xf32> to vector<2x8x8xf32>
    %203 = arith.mulf %198, %202 : vector<2x8x8xf32>
    %204 = arith.truncf %203 : vector<2x8x8xf32> to vector<2x8x8xbf16>
    "tpu.trace_start"() <{level = 10 : i32, message = "bqk,bkd->bqd"}> : () -> ()
    %cst_61 = arith.constant dense<0.000000e+00> : vector<2x8x32xf32>
    %205 = tpu.matmul %204, %192, %cst_61 {dimension_numbers = #tpu.dot_dimension_numbers<[2], [1], [1], [2], [0, 0, 0, 1, 1, 2], [0], [0]>} : vector<2x8x8xbf16>, vector<2x8x32xbf16>, vector<2x8x32xf32> -> vector<2x8x32xf32>
    "tpu.trace_stop"() : () -> ()
    %206 = arith.addf %186, %205 : vector<2x8x32xf32>
    %207 = vector.extract_strided_slice %167 {offsets = [0, 0, 16], sizes = [2, 8, 8], strides = [1, 1, 1]} : vector<2x8x192xf32> to vector<2x8x8xf32>
    %208 = arith.truncf %207 : vector<2x8x8xf32> to vector<2x8x8xbf16>
    %209 = vector.extract_strided_slice %167 {offsets = [0, 0, 48], sizes = [2, 8, 8], strides = [1, 1, 1]} : vector<2x8x192xf32> to vector<2x8x8xf32>
    %210 = arith.truncf %209 : vector<2x8x8xf32> to vector<2x8x8xbf16>
    %211 = vector.extract_strided_slice %167 {offsets = [0, 0, 128], sizes = [2, 8, 32], strides = [1, 1, 1]} : vector<2x8x192xf32> to vector<2x8x32xf32>
    %212 = arith.truncf %211 : vector<2x8x32xf32> to vector<2x8x32xbf16>
    "tpu.trace_start"() <{level = 10 : i32, message = "bqd,bkd->bqk"}> : () -> ()
    %cst_62 = arith.constant dense<0.000000e+00> : vector<2x8x8xf32>
    %213 = tpu.matmul %208, %210, %cst_62 {dimension_numbers = #tpu.dot_dimension_numbers<[2], [2], [1], [1], [0, 0, 0, 1, 1, 1], [0], [0]>} : vector<2x8x8xbf16>, vector<2x8x8xbf16>, vector<2x8x8xf32> -> vector<2x8x8xf32>
    "tpu.trace_stop"() : () -> ()
    %cst_63 = arith.constant dense<0xFF800000> : vector<2x8xf32>
    %214 = vector.multi_reduction <maximumf>, %213, %cst_63 [2] : vector<2x8x8xf32> to vector<2x8xf32>
    %215 = vector.shape_cast %214 : vector<2x8xf32> to vector<2x8x1xf32>
    %216 = vector.broadcast %215 : vector<2x8x1xf32> to vector<2x8x8xf32>
    %217 = arith.subf %213, %216 : vector<2x8x8xf32>
    %218 = math.exp %217 : vector<2x8x8xf32>
    %cst_64 = arith.constant dense<0.000000e+00> : vector<2x8xf32>
    %219 = vector.multi_reduction <add>, %218, %cst_64 [2] : vector<2x8x8xf32> to vector<2x8xf32>
    %220 = vector.shape_cast %219 : vector<2x8xf32> to vector<2x8x1xf32>
    %221 = tpu.reciprocal %220 {approx = true} : vector<2x8x1xf32> -> vector<2x8x1xf32>
    %222 = vector.broadcast %221 : vector<2x8x1xf32> to vector<2x8x8xf32>
    %223 = arith.mulf %218, %222 : vector<2x8x8xf32>
    %224 = arith.truncf %223 : vector<2x8x8xf32> to vector<2x8x8xbf16>
    "tpu.trace_start"() <{level = 10 : i32, message = "bqk,bkd->bqd"}> : () -> ()
    %cst_65 = arith.constant dense<0.000000e+00> : vector<2x8x32xf32>
    %225 = tpu.matmul %224, %212, %cst_65 {dimension_numbers = #tpu.dot_dimension_numbers<[2], [1], [1], [2], [0, 0, 0, 1, 1, 2], [0], [0]>} : vector<2x8x8xbf16>, vector<2x8x32xbf16>, vector<2x8x32xf32> -> vector<2x8x32xf32>
    "tpu.trace_stop"() : () -> ()
    %226 = arith.addf %206, %225 : vector<2x8x32xf32>
    %227 = vector.extract_strided_slice %167 {offsets = [0, 0, 24], sizes = [2, 8, 8], strides = [1, 1, 1]} : vector<2x8x192xf32> to vector<2x8x8xf32>
    %228 = arith.truncf %227 : vector<2x8x8xf32> to vector<2x8x8xbf16>
    %229 = vector.extract_strided_slice %167 {offsets = [0, 0, 56], sizes = [2, 8, 8], strides = [1, 1, 1]} : vector<2x8x192xf32> to vector<2x8x8xf32>
    %230 = arith.truncf %229 : vector<2x8x8xf32> to vector<2x8x8xbf16>
    %231 = vector.extract_strided_slice %167 {offsets = [0, 0, 160], sizes = [2, 8, 32], strides = [1, 1, 1]} : vector<2x8x192xf32> to vector<2x8x32xf32>
    %232 = arith.truncf %231 : vector<2x8x32xf32> to vector<2x8x32xbf16>
    "tpu.trace_start"() <{level = 10 : i32, message = "bqd,bkd->bqk"}> : () -> ()
    %cst_66 = arith.constant dense<0.000000e+00> : vector<2x8x8xf32>
    %233 = tpu.matmul %228, %230, %cst_66 {dimension_numbers = #tpu.dot_dimension_numbers<[2], [2], [1], [1], [0, 0, 0, 1, 1, 1], [0], [0]>} : vector<2x8x8xbf16>, vector<2x8x8xbf16>, vector<2x8x8xf32> -> vector<2x8x8xf32>
    "tpu.trace_stop"() : () -> ()
    %cst_67 = arith.constant dense<0xFF800000> : vector<2x8xf32>
    %234 = vector.multi_reduction <maximumf>, %233, %cst_67 [2] : vector<2x8x8xf32> to vector<2x8xf32>
    %235 = vector.shape_cast %234 : vector<2x8xf32> to vector<2x8x1xf32>
    %236 = vector.broadcast %235 : vector<2x8x1xf32> to vector<2x8x8xf32>
    %237 = arith.subf %233, %236 : vector<2x8x8xf32>
    %238 = math.exp %237 : vector<2x8x8xf32>
    %cst_68 = arith.constant dense<0.000000e+00> : vector<2x8xf32>
    %239 = vector.multi_reduction <add>, %238, %cst_68 [2] : vector<2x8x8xf32> to vector<2x8xf32>
    %240 = vector.shape_cast %239 : vector<2x8xf32> to vector<2x8x1xf32>
    %241 = tpu.reciprocal %240 {approx = true} : vector<2x8x1xf32> -> vector<2x8x1xf32>
    %242 = vector.broadcast %241 : vector<2x8x1xf32> to vector<2x8x8xf32>
    %243 = arith.mulf %238, %242 : vector<2x8x8xf32>
    %244 = arith.truncf %243 : vector<2x8x8xf32> to vector<2x8x8xbf16>
    "tpu.trace_start"() <{level = 10 : i32, message = "bqk,bkd->bqd"}> : () -> ()
    %cst_69 = arith.constant dense<0.000000e+00> : vector<2x8x32xf32>
    %245 = tpu.matmul %244, %232, %cst_69 {dimension_numbers = #tpu.dot_dimension_numbers<[2], [1], [1], [2], [0, 0, 0, 1, 1, 2], [0], [0]>} : vector<2x8x8xbf16>, vector<2x8x32xbf16>, vector<2x8x32xf32> -> vector<2x8x32xf32>
    "tpu.trace_stop"() : () -> ()
    %246 = arith.addf %226, %245 : vector<2x8x32xf32>
    %247 = vector.shape_cast %246 : vector<2x8x32xf32> to vector<16x32xf32>
    %248 = arith.addf %152, %247 : vector<16x32xf32>
    %cst_70 = arith.constant dense<0.000000e+00> : vector<16xf32>
    %249 = vector.multi_reduction <add>, %248, %cst_70 [1] : vector<16x32xf32> to vector<16xf32>
    %250 = vector.shape_cast %249 : vector<16xf32> to vector<16x1xf32>
    %cst_71 = arith.constant 3.200000e+01 : f32
    %251 = vector.broadcast %cst_71 : f32 to vector<16x1xf32>
    %252 = arith.divf %250, %251 : vector<16x1xf32>
    %253 = vector.broadcast %252 : vector<16x1xf32> to vector<16x32xf32>
    %254 = arith.subf %248, %253 : vector<16x32xf32>
    %255 = arith.mulf %254, %254 : vector<16x32xf32>
    %cst_72 = arith.constant dense<0.000000e+00> : vector<16xf32>
    %256 = vector.multi_reduction <add>, %255, %cst_72 [1] : vector<16x32xf32> to vector<16xf32>
    %257 = vector.shape_cast %256 : vector<16xf32> to vector<16x1xf32>
    %cst_73 = arith.constant 3.200000e+01 : f32
    %258 = vector.broadcast %cst_73 : f32 to vector<16x1xf32>
    %259 = arith.divf %257, %258 : vector<16x1xf32>
    %260 = vector.broadcast %252 : vector<16x1xf32> to vector<16x32xf32>
    %261 = arith.subf %248, %260 : vector<16x32xf32>
    %262 = vector.broadcast %157 : vector<1x32xf32> to vector<16x32xf32>
    %263 = arith.mulf %262, %261 : vector<16x32xf32>
    %cst_74 = arith.constant 9.99999974E-6 : f32
    %264 = vector.broadcast %cst_74 : f32 to vector<16x1xf32>
    %265 = arith.addf %259, %264 : vector<16x1xf32>
    %266 = math.rsqrt %265 : vector<16x1xf32>
    %267 = vector.broadcast %266 : vector<16x1xf32> to vector<16x32xf32>
    %268 = arith.mulf %263, %267 : vector<16x32xf32>
    %269 = vector.broadcast %158 : vector<1x32xf32> to vector<16x32xf32>
    %270 = arith.addf %268, %269 : vector<16x32xf32>
    %271 = arith.truncf %270 : vector<16x32xf32> to vector<16x32xbf16>
    %cst_75 = arith.constant dense<0.000000e+00> : vector<16x64xf32>
    %272 = tpu.matmul %271, %154, %cst_75 {dimension_numbers = #tpu.dot_dimension_numbers<[1], [0], [0], [1], [0, 0, 1, 1], [], []>} : vector<16x32xbf16>, vector<32x64xbf16>, vector<16x64xf32> -> vector<16x64xf32>
    %273 = vector.broadcast %159 : vector<1x64xf32> to vector<16x64xf32>
    %274 = arith.addf %272, %273 : vector<16x64xf32>
    %cst_76 = arith.constant 0.000000e+00 : f32
    %275 = vector.broadcast %cst_76 : f32 to vector<16x64xf32>
    %276 = arith.maximumf %274, %275 : vector<16x64xf32>
    %277 = arith.truncf %276 : vector<16x64xf32> to vector<16x64xbf16>
    %cst_77 = arith.constant dense<0.000000e+00> : vector<16x32xf32>
    %278 = tpu.matmul %277, %155, %cst_77 {dimension_numbers = #tpu.dot_dimension_numbers<[1], [0], [0], [1], [0, 0, 1, 1], [], []>} : vector<16x64xbf16>, vector<64x32xbf16>, vector<16x32xf32> -> vector<16x32xf32>
    %279 = vector.broadcast %160 : vector<1x32xf32> to vector<16x32xf32>
    %280 = arith.addf %278, %279 : vector<16x32xf32>
    %281 = arith.addf %270, %280 : vector<16x32xf32>
    %cst_78 = arith.constant dense<0.000000e+00> : vector<16xf32>
    %282 = vector.multi_reduction <add>, %281, %cst_78 [1] : vector<16x32xf32> to vector<16xf32>
    %283 = vector.shape_cast %282 : vector<16xf32> to vector<16x1xf32>
    %cst_79 = arith.constant 3.200000e+01 : f32
    %284 = vector.broadcast %cst_79 : f32 to vector<16x1xf32>
    %285 = arith.divf %283, %284 : vector<16x1xf32>
    %286 = vector.broadcast %285 : vector<16x1xf32> to vector<16x32xf32>
    %287 = arith.subf %281, %286 : vector<16x32xf32>
    %288 = arith.mulf %287, %287 : vector<16x32xf32>
    %cst_80 = arith.constant dense<0.000000e+00> : vector<16xf32>
    %289 = vector.multi_reduction <add>, %288, %cst_80 [1] : vector<16x32xf32> to vector<16xf32>
    %290 = vector.shape_cast %289 : vector<16xf32> to vector<16x1xf32>
    %cst_81 = arith.constant 3.200000e+01 : f32
    %291 = vector.broadcast %cst_81 : f32 to vector<16x1xf32>
    %292 = arith.divf %290, %291 : vector<16x1xf32>
    %293 = vector.broadcast %285 : vector<16x1xf32> to vector<16x32xf32>
    %294 = arith.subf %281, %293 : vector<16x32xf32>
    %295 = vector.broadcast %161 : vector<1x32xf32> to vector<16x32xf32>
    %296 = arith.mulf %295, %294 : vector<16x32xf32>
    %cst_82 = arith.constant 9.99999974E-6 : f32
    %297 = vector.broadcast %cst_82 : f32 to vector<16x1xf32>
    %298 = arith.addf %292, %297 : vector<16x1xf32>
    %299 = math.rsqrt %298 : vector<16x1xf32>
    %300 = vector.broadcast %299 : vector<16x1xf32> to vector<16x32xf32>
    %301 = arith.mulf %296, %300 : vector<16x32xf32>
    %302 = vector.broadcast %162 : vector<1x32xf32> to vector<16x32xf32>
    %303 = arith.addf %301, %302 : vector<16x32xf32>
    %304 = vector.shape_cast %303 : vector<16x32xf32> to vector<2x8x32xf32>
    %c0_83 = arith.constant 0 : index
    %c0_84 = arith.constant 0 : index
    %c0_85 = arith.constant 0 : index
    %305 = vector.load %arg3[%c0_83, %c0_84, %c0_85] : memref<2x8x32xf32, #tpu.memory_space<vmem>>, vector<2x8x32xf32>
    tpu.vector_store %arg3[%c0_83, %c0_84, %c0_85], %304 {strides = array<i32>} : memref<2x8x32xf32, #tpu.memory_space<vmem>>, vector<2x8x32xf32>,
    return
  }
}

</mosaic_0001>

<bundles_post_ra>
// kernel: tpu_custom_call.1
= control target key start
LH: loop header
LB: loop body
LE: loop exit
PB: predicated region body
PF: predicated region fallthrough
CT: control target
= control target key end

     0   :  { %s2237_s0 = inlined_call_operand.vmem [shape: f32[2,8,32], index: 0, kind: input, shape index: {}]   ;;  %s2238_s1 = inlined_call_operand.vmem [shape: bf16[256,192], index: 1, kind: input, shape index: {}]   ;;  %s2239_s2 = inlined_call_operand.vmem [shape: f32[16,192], index: 2, kind: input, shape index: {}]   ;;  %s2240_s3 = inlined_call_operand.hbm [shape: f32[2,8,32], index: 3, kind: output, shape index: {}]  }
   0x1   :  { %v1488_v0 = vld [vmem:[%s2238_s1 + $0x10] sm:$0xf]  ;;  %v1602_v1 = vld [vmem:[%s2238_s1 + $0x14] sm:$0xf0]  ;;  %v1480_v2 = vld [vmem:[%s2238_s1] sm:$0xf] }
   0x2   :  { %v1489_v3 = vor.u32 %v1602_v1, %v1488_v0  ;;  %v1600_v4 = vld [vmem:[%s2238_s1 + $0x4] sm:$0xf0] }
   0x3   :  { %8 = vsyncpa [#allocation3], 0  ;;  %v1481_v5 = vor.u32 %v1600_v4, %v1480_v2  ;;  %v1788_v6 = vld [vmem:[%s2237_s0] sm:$0xff]  ;;  %v1793_v7 = vld [vmem:[%s2237_s0 + $0x8] sm:$0xff]  ;;  %vm67_vm0 = vcmask 261120   ;;  %s1740_s0 = smov 120  }
   0x4   :  { %77 = vmatpush.bf16.msra.mxu0 %v1489_v3  ;;  %v41_v8 = vpack.c.bf16 %v1793_v7, %v1788_v6  ;;  %v1801_v9 = vld [vmem:[%s2239_s2] ss:$8 sm:$0x3]  ;;  %s1741_s26 = smov 88   ;;  %s1742_s27 = smov 96   ;;  %vm106_vm1 = vcmask 64512  }
   0x5   :  { %v43_v10 = vperm.slane %v1801_v9, 0  ;;  %s1743_s28 = smov 32   ;;  %s1744_s29 = smov 80   ;;  %v1601_v21 = vld [vmem:[%s2238_s1 + $0x14] sm:$0xf]  ;;  %vm249_vm2 = vcmask 1043456  }
   0x6   :  { %v1490_v22 = vld [vmem:[%s2238_s1 + $0x18] sm:$0xf0]  ;;  %v1599_v23 = vld [vmem:[%s2238_s1 + $0x4] sm:$0xf]  ;;  %v1482_v25 = vld [vmem:[%s2238_s1 + $0x8] sm:$0xf0] }
   0x7   :  { %v1493_v24 = vor.u32 %v1601_v21, %v1490_v22  ;;  %v1485_v26 = vor.u32 %v1599_v23, %v1482_v25  ;;  %s1745_s11 = smov 112   ;;  %s1746_s12 = smov 72   ;;  %vm675_vm10 = vcmask 523264  }
   0x8   :  { %78 = vmatpush.bf16.msra.mxu0 %v1481_v5  ;;  %s1747_s13 = smov 104   ;;  %s1748_s14 = smov 64  }
   0x9   :  { %91 = vmatpush.bf16.msra.mxu1 %v1493_v24  ;;  %s1466_s10 = sshll.u32 %s2240_s3, 4  ;;  %s1752_s15 = smov 8   ;;  %s1467_s10 = int_to_ptr.hbm [resolvable:$true] %s1466_s10 }
   0xb   :  { %1494 = vmatmul.msk.bf16.vlgmr.msra.gmra.mxu0 %vm67_vm0, %v41_v8 }
   0xd   :  { %92 = vmatpush.bf16.msra.mxu1 %v1485_v26 }
  0x10   :  { %1495 = vmatmul.msk.bf16.vlgmr.msra.gmra.mxu1 %vm67_vm0, %v41_v8 }
  0x88   :  { %v80_v11 = vpop.f32.mrf.mxu0 }
  0x89   :  { %v81_v12 = vadd.f32 %v80_v11, %v43_v10 }
  0x8b   :  { %v99_v13 = vpack.c.bf16 %v81_v12, %v81_v12 }
  0x8d   :  { %v102_v14 = vunpack.c.l.b16 %v99_v13  ;;  %v1855_v41 = vpop.f32.mrf.mxu1 }
  0x8f   :  { %v1804_v15 = vpack.c.b16 %v102_v14, %v102_v14 }
  0x90   :  { %v82_v16 = vpop.f32.mrf.mxu0 }
  0x91   :  { %v83_v17 = vadd.f32 %v82_v16, %v43_v10  ;;  %174 = vrot.lane.b32.xlu1 %v1804_v15, %s1740_s0  ;;  %176 = vrot.lane.b32.xlu0 %v1804_v15, %s1741_s26 }
  0x93   :  { %v100_v18 = vpack.c.bf16 %v83_v17, %v83_v17 }
  0x95   :  { %v127_v19 = vunpack.c.l.b16 %v100_v18  ;;  %v1857_v42 = vpop.f32.mrf.mxu1 }
  0x97   :  { %v1810_v20 = vpack.c.b16 %v127_v19, %v127_v19 }
  0x99   :  { %197 = vrot.lane.b32.xlu1 %v1810_v20, %s1740_s0  ;;  %199 = vrot.lane.b32.xlu0 %v1810_v20, %s1741_s26 }
  0xa1   :  { %129 = vrot.lane.b32.xlu1 %v1810_v20, %s1742_s27  ;;  %104 = vrot.lane.b32.xlu0 %v1804_v15, %s1742_s27 }
  0xa9   :  { %244 = vrot.lane.b32.xlu1 %v1804_v15, %s1743_s28 }
  0xb1   :  { %333 = vrot.lane.b32.xlu1 %v1804_v15, %s1744_s29 }
  0xb9   :  { %356 = vrot.lane.b32.xlu1 %v1810_v20, %s1744_s29 }
  0xc1   :  { %331 = vrot.lane.b32.xlu1 %v1804_v15, %s1745_s11 }
  0xc9   :  { %443 = vrot.lane.b32.xlu1 %v1804_v15, %s1746_s12 }
  0xd1   :  { %441 = vrot.lane.b32.xlu1 %v1804_v15, %s1747_s13 }
 0x103   :  { %v175_v27 = vpop.permute.xlu1 %174  ;;  %v177_v28 = vpop.permute.xlu0 %176 }
 0x104   :  { %v182_v29 = vsel %vm106_vm1, %v177_v28, 0 }
 0x105   :  { %191 = vmatpush.bf16.xpose.msrb.mxu0 %v182_v29 }
 0x10b   :  { %v198_v30 = vpop.permute.xlu1 %197  ;;  %v200_v31 = vpop.permute.xlu0 %199 }
 0x10c   :  { %1498 = vmatmul.msk.bf16.vlgmr.msrb.gmra.mxu0 %vm106_vm1, %v175_v27  ;;  %v205_v32 = vsel %vm106_vm1, %v200_v31, 0 }
 0x10d   :  { %214 = vmatpush.bf16.xpose.msrb.mxu1 %v205_v32 }
 0x113   :  { %v130_v33 = vpop.permute.xlu1 %129  ;;  %v105_v34 = vpop.permute.xlu0 %104 }
 0x114   :  { %1499 = vmatmul.msk.bf16.vlgmr.msrb.gmra.mxu1 %vm106_vm1, %v198_v30  ;;  %v111_v35 = vsel %vm106_vm1, %v105_v34, 0  ;;  %v135_v36 = vsel %vm106_vm1, %v130_v33, 0 }
 0x115   :  { %120 = vmatpush.bf16.xpose.msra.mxu2 %v111_v35  ;;  %144 = vmatpush.bf16.xpose.msra.mxu3 %v135_v36 }
 0x11b   :  { %v245_v37 = vpop.permute.xlu1 %244 }
 0x11c   :  { %1496 = vmatmul.msk.bf16.vlgmr.msra.gmra.mxu2 %vm106_vm1, %v99_v13  ;;  %1497 = vmatmul.msk.bf16.vlgmr.msra.gmra.mxu3 %vm106_vm1, %v100_v18  ;;  %v251_v38 = vsel %vm249_vm2, %v245_v37, 0 }
 0x11d   :  { %260 = vmatpush.bf16.msrb.mxu2 %v251_v38 }
 0x123   :  { %v334_v39 = vpop.permute.xlu1 %333 }
 0x124   :  { %v339_v40 = vsel %vm106_vm1, %v334_v39, 0 }
 0x125   :  { %348 = vmatpush.bf16.xpose.msra.mxu2 %v339_v40 }
 0x12b   :  { %v357_v1 = vpop.permute.xlu1 %356 }
 0x12c   :  { %v362_v14 = vsel %vm106_vm1, %v357_v1, 0 }
 0x133   :  { %v332_v2 = vpop.permute.xlu1 %331 }
 0x13b   :  { %v444_v3 = vpop.permute.xlu1 %443 }
 0x13c   :  { %v449_v17 = vsel %vm106_vm1, %v444_v3, 0 }
 0x143   :  { %v442_v8 = vpop.permute.xlu1 %441 }
 0x189   :  { %v193_v43 = vpop.f32.mrf.mxu0 }
 0x18a   :  { %v220_v44 = vsel %vm106_vm1, %v193_v43, -inf }
 0x18b   :  { %221 = vmax.xlane.f32.xlu2 %v220_v44 }
 0x191   :  { %v195_v45 = vpop.f32.mrf.mxu0  ;;  %v216_v46 = vpop.f32.mrf.mxu1 }
 0x192   :  { %v223_v47 = vsel %vm106_vm1, %v216_v46, -inf }
 0x193   :  { %224 = vmax.xlane.f32.xlu2 %v223_v47  ;;  %v44_v47 = vperm.slane %v1801_v9, 1 }
 0x199   :  { %v218_v48 = vpop.f32.mrf.mxu1 }
 0x19f   :  { %v122_v49 = vpop.f32.mrf.mxu2  ;;  %v146_v50 = vpop.f32.mrf.mxu3 }
 0x1a0   :  { %v153_v51 = vsel %vm106_vm1, %v146_v50, -inf  ;;  %v150_v0 = vsel %vm106_vm1, %v122_v49, -inf }
 0x1a1   :  { %154 = vmax.xlane.f32.xlu1 %v153_v51  ;;  %v95_v51 = vadd.f32 %v1855_v41, %v44_v47 }
 0x1a7   :  { %v124_v52 = vpop.f32.mrf.mxu2  ;;  %v148_v53 = vpop.f32.mrf.mxu3 }
 0x1a8   :  { %v329_v52 = vpack.c.bf16 %v95_v51, %v95_v51 }
 0x1aa   :  { %v405_v3 = vsel %vm249_vm2, %v329_v52, 0 }
 0x1fe   :  { %v222_v54 = vpop.xlane.xlu2 %221 }
 0x1ff   :  { %v226_v55 = vsub.f32 %v193_v43, %v222_v54 }
 0x201   :  { %v228_v56 = vmul.f32 1.442695, %v226_v55 }
 0x203   :  { %1632 = vpow2.f32 %v228_v56  ;;  %v512_v56 = vunpack.c.l.b16 %v329_v52 }
 0x206   :  { %v225_v57 = vpop.xlane.xlu2 %224 }
 0x207   :  { %v227_v58 = vsub.f32 %v216_v46, %v225_v57  ;;  %v513_v57 = vpack.c.b16 %v512_v56, %v512_v56 }
 0x209   :  { %v1633_v59 = vpop.eup %1632  ;;  %v230_v60 = vmul.f32 1.442695, %v227_v58 }
 0x20a   :  { %v232_v61 = vsel %vm106_vm1, %v1633_v59, 0.0 }
 0x20b   :  { %1634 = vpow2.f32 %v230_v60  ;;  %233 = vadd.xlane.f32.xlu2 %v232_v61 }
 0x211   :  { %v1635_v62 = vpop.eup %1634 }
 0x212   :  { %v235_v63 = vsel %vm106_vm1, %v1635_v62, 0.0 }
 0x213   :  { %236 = vadd.xlane.f32.xlu0 %v235_v63 }
 0x214   :  { %v155_v19 = vpop.xlane.xlu1 %154 }
 0x215   :  { %v157_v26 = vsub.f32 %v146_v50, %v155_v19 }
 0x217   :  { %v160_v28 = vmul.f32 1.442695, %v157_v26  ;;  %v97_v26 = vadd.f32 %v1857_v42, %v44_v47 }
 0x21b   :  { %151 = vmax.xlane.f32.xlu0 %v150_v0 }
 0x223   :  { %266 = vrot.lane.b32.xlu2 %v1810_v20, %s1743_s28 }
 0x22b   :  { %354 = vrot.lane.b32.xlu2 %v1810_v20, %s1745_s11 }
 0x233   :  { %466 = vrot.lane.b32.xlu2 %v1810_v20, %s1746_s12 }
 0x23b   :  { %464 = vrot.lane.b32.xlu2 %v1810_v20, %s1747_s13 }
 0x27e   :  { %v234_v4 = vpop.xlane.xlu2 %233 }
 0x27f   :  { %1636 = vrcp.f32 %v234_v4 }
 0x285   :  { %v1637_v5 = vpop.eup %1636 }
 0x286   :  { %v240_v10 = vmul.f32 %v1637_v5, %v1633_v59  ;;  %v267_v11 = vpop.permute.xlu2 %266  ;;  %v237_v12 = vpop.xlane.xlu0 %236 }
 0x287   :  { %1638 = vrcp.f32 %v237_v12  ;;  %v272_v13 = vsel %vm249_vm2, %v267_v11, 0 }
 0x288   :  { %281 = vmatpush.bf16.msrb.mxu3 %v272_v13  ;;  %v242_v16 = vpack.c.bf16 %v240_v10, %v240_v10 }
 0x28a   :  { %1500 = vmatmul.msk.bf16.vlgmr.msrb.gmra.mxu2 %vm106_vm1, %v242_v16 }
 0x28b   :  { %458 = vmatpush.bf16.xpose.msrb.mxu2 %v449_v17 }
 0x28c   :  { %371 = vmatpush.bf16.xpose.msra.mxu3 %v362_v14 }
 0x28d   :  { %v1639_v18 = vpop.eup %1638 }
 0x28e   :  { %v241_v21 = vmul.f32 %v1639_v18, %v1635_v62  ;;  %v355_v22 = vpop.permute.xlu2 %354  ;;  %v152_v23 = vpop.xlane.xlu0 %151 }
 0x28f   :  { %v156_v24 = vsub.f32 %v122_v49, %v152_v23 }
 0x290   :  { %v243_v25 = vpack.c.bf16 %v241_v21, %v241_v21 }
 0x291   :  { %v158_v27 = vmul.f32 1.442695, %v156_v24 }
 0x292   :  { %1501 = vmatmul.msk.bf16.vlgmr.msrb.gmra.mxu3 %vm106_vm1, %v243_v25 }
 0x293   :  { %1640 = vpow2.f32 %v158_v27 }
 0x294   :  { %1642 = vpow2.f32 %v160_v28  ;;  %v330_v28 = vpack.c.bf16 %v97_v26, %v97_v26 }
 0x296   :  { %v467_v29 = vpop.permute.xlu2 %466 }
 0x297   :  { %v472_v30 = vsel %vm106_vm1, %v467_v29, 0 }
 0x298   :  { %481 = vmatpush.bf16.xpose.msrb.mxu3 %v472_v30 }
 0x299   :  { %v1641_v31 = vpop.eup %1640 }
 0x29a   :  { %1504 = vmatmul.msk.bf16.vlgmr.msra.gmra.mxu2 %vm106_vm1, %v332_v2  ;;  %v162_v32 = vsel %vm106_vm1, %v1641_v31, 0.0  ;;  %v1881_v33 = vpop.eup %1642 }
 0x29b   :  { %163 = vadd.xlane.f32.xlu0 %v162_v32  ;;  %v165_v34 = vsel %vm106_vm1, %v1881_v33, 0.0  ;;  %v424_v32 = vsel %vm249_vm2, %v330_v28, 0 }
 0x29e   :  { %v465_v35 = vpop.permute.xlu2 %464 }
 0x2a2   :  { %1505 = vmatmul.msk.bf16.vlgmr.msra.gmra.mxu3 %vm106_vm1, %v355_v22 }
 0x2a3   :  { %166 = vadd.xlane.f32.xlu0 %v165_v34 }
 0x2aa   :  { %1508 = vmatmul.msk.bf16.vlgmr.msrb.gmra.mxu2 %vm106_vm1, %v442_v8 }
 0x2b2   :  { %1509 = vmatmul.msk.bf16.vlgmr.msrb.gmra.mxu3 %vm106_vm1, %v465_v35  ;;  %v536_v35 = vunpack.c.l.b16 %v330_v28 }
 0x30d   :  { %v1888_v36 = vpop.f32.mrf.mxu2 }
 0x30e   :  { %v164_v58 = vpop.xlane.xlu0 %163 }
 0x30f   :  { %1644 = vrcp.f32 %v164_v58 }
 0x315   :  { %v264_v37 = vpop.f32.mrf.mxu2  ;;  %v1890_v38 = vpop.f32.mrf.mxu3 }
 0x316   :  { %v167_v41 = vpop.xlane.xlu0 %166  ;;  %v1645_v62 = vpop.eup %1644  ;;  %v537_v37 = vpack.c.b16 %v536_v35, %v536_v35 }
 0x317   :  { %v170_v63 = vmul.f32 %v1645_v62, %v1641_v31 }
 0x319   :  { %v172_v5 = vpack.c.bf16 %v170_v63, %v170_v63 }
 0x31d   :  { %v285_v39 = vpop.f32.mrf.mxu3  ;;  %v350_v40 = vpop.f32.mrf.mxu2 }
 0x31e   :  { %v377_v43 = vsel %vm106_vm1, %v350_v40, -inf }
 0x31f   :  { %378 = vmax.xlane.f32.xlu2 %v377_v43 }
 0x325   :  { %v352_v44 = vpop.f32.mrf.mxu2  ;;  %v373_v45 = vpop.f32.mrf.mxu3 }
 0x326   :  { %v380_v46 = vsel %vm106_vm1, %v373_v45, -inf }
 0x327   :  { %381 = vmax.xlane.f32.xlu0 %v380_v46 }
 0x32d   :  { %v375_v48 = vpop.f32.mrf.mxu3  ;;  %v460_v49 = vpop.f32.mrf.mxu2 }
 0x32e   :  { %v487_v50 = vsel %vm106_vm1, %v460_v49, -inf }
 0x32f   :  { %488 = vmax.xlane.f32.xlu0 %v487_v50 }
 0x335   :  { %v462_v53 = vpop.f32.mrf.mxu2  ;;  %v483_v54 = vpop.f32.mrf.mxu3 }
 0x336   :  { %v490_v55 = vsel %vm106_vm1, %v483_v54, -inf }
 0x337   :  { %287 = vrot.lane.b32.xlu2 %v1804_v15, %s1748_s14  ;;  %491 = vmax.xlane.f32.xlu0 %v490_v55 }
 0x33d   :  { %v485_v9 = vpop.f32.mrf.mxu3 }
 0x33f   :  { %514 = vrot.lane.b32.xlu2 %v513_v57, %s1742_s27 }
 0x34b   :  { %308 = vrot.lane.b32.xlu0 %v1810_v20, %s1748_s14 }
 0x392   :  { %v379_v59 = vpop.xlane.xlu2 %378 }
 0x393   :  { %v383_v60 = vsub.f32 %v350_v40, %v379_v59 }
 0x395   :  { %v385_v61 = vmul.f32 1.442695, %v383_v60 }
 0x397   :  { %1646 = vpow2.f32 %v385_v61 }
 0x39a   :  { %v288_v0 = vpop.permute.xlu2 %287  ;;  %v382_v15 = vpop.xlane.xlu0 %381 }
 0x39b   :  { %v293_v1 = vsel %vm249_vm2, %v288_v0, 0  ;;  %v384_v2 = vsub.f32 %v373_v45, %v382_v15 }
 0x39c   :  { %302 = vmatpush.bf16.msra.mxu0 %v293_v1 }
 0x39d   :  { %v1647_v4 = vpop.eup %1646  ;;  %v387_v20 = vmul.f32 1.442695, %v384_v2 }
 0x39e   :  { %v389_v8 = vsel %vm106_vm1, %v1647_v4, 0.0 }
 0x39f   :  { %1648 = vpow2.f32 %v387_v20  ;;  %390 = vadd.xlane.f32.xlu1 %v389_v8  ;;  %1502 = vmatmul.msk.bf16.vlgmr.msra.gmra.mxu0 %vm106_vm1, %v172_v5 }
 0x3a0   :  { %414 = vmatpush.bf16.msrb.mxu0 %v405_v3 }
 0x3a2   :  { %v515_v10 = vpop.permute.xlu2 %514  ;;  %v489_v11 = vpop.xlane.xlu0 %488 }
 0x3a3   :  { %v520_v12 = vsel %vm249_vm2, %v515_v10, 0  ;;  %v493_v13 = vsub.f32 %v460_v49, %v489_v11 }
 0x3a4   :  { %529 = vmatpush.bf16.msra.mxu0 %v520_v12 }
 0x3a5   :  { %v1649_v14 = vpop.eup %1648  ;;  %v495_v16 = vmul.f32 1.442695, %v493_v13  ;;  %v1749_v13 = vmov 32.0  }
 0x3a6   :  { %v392_v17 = vsel %vm106_vm1, %v1649_v14, 0.0 }
 0x3a7   :  { %1650 = vpow2.f32 %v495_v16  ;;  %393 = vadd.xlane.f32.xlu1 %v392_v17 }
 0x3aa   :  { %v492_v18 = vpop.xlane.xlu0 %491 }
 0x3ab   :  { %v494_v19 = vsub.f32 %v483_v54, %v492_v18 }
 0x3ad   :  { %v1651_v21 = vpop.eup %1650  ;;  %v497_v22 = vmul.f32 1.442695, %v494_v19 }
 0x3ae   :  { %v499_v23 = vsel %vm106_vm1, %v1651_v21, 0.0 }
 0x3af   :  { %1652 = vpow2.f32 %v497_v22  ;;  %500 = vadd.xlane.f32.xlu1 %v499_v23 }
 0x3b0   :  { %1654 = vrcp.f32 %v167_v41 }
 0x3b5   :  { %v1653_v24 = vpop.eup %1652 }
 0x3b6   :  { %v502_v25 = vsel %vm106_vm1, %v1653_v24, 0.0  ;;  %v1655_v27 = vpop.eup %1654 }
 0x3b7   :  { %503 = vadd.xlane.f32.xlu0 %v502_v25  ;;  %v171_v29 = vmul.f32 %v1655_v27, %v1881_v33 }
 0x3b9   :  { %v173_v34 = vpack.c.bf16 %v171_v29, %v171_v29 }
 0x3bd   :  { %v309_v30 = vpop.permute.xlu0 %308 }
 0x3be   :  { %v314_v31 = vsel %vm249_vm2, %v309_v30, 0 }
 0x3bf   :  { %323 = vmatpush.bf16.msra.mxu1 %v314_v31 }
 0x3c2   :  { %1503 = vmatmul.msk.bf16.vlgmr.msra.gmra.mxu1 %vm106_vm1, %v173_v34  ;;  %v1604_v34 = vld [vmem:[%s2238_s1 + $0x34] sm:$0xf0] }
 0x3c3   :  { %433 = vmatpush.bf16.msrb.mxu1 %v424_v32  ;;  %v1518_v32 = vld [vmem:[%s2238_s1 + $0x30] sm:$0xf] }
 0x3c4   :  { %v1519_v35 = vor.u32 %v1604_v34, %v1518_v32 }
 0x3c6   :  { %640 = vmatpush.bf16.msra.mxu2 %v1519_v35 }
 0x3c8   :  { %538 = vrot.lane.b32.xlu1 %v537_v37, %s1742_s27  ;;  %v1514_v37 = vld [vmem:[%s2238_s1 + $0x20] sm:$0xf] }
 0x412   :  { %v391_v42 = vpop.xlane.xlu1 %390 }
 0x413   :  { %1656 = vrcp.f32 %v391_v42  ;;  %v1603_v42 = vld [vmem:[%s2238_s1 + $0x24] sm:$0xf0] }
 0x419   :  { %v1657_v39 = vpop.eup %1656 }
 0x41a   :  { %v397_v40 = vmul.f32 %v1657_v39, %v1647_v4  ;;  %v394_v43 = vpop.xlane.xlu1 %393  ;;  %v1515_v39 = vor.u32 %v1603_v42, %v1514_v37 }
 0x41b   :  { %1658 = vrcp.f32 %v394_v43 }
 0x41c   :  { %v399_v33 = vpack.c.bf16 %v397_v40, %v397_v40  ;;  %v304_v44 = vpop.f32.mrf.mxu0  ;;  %641 = vmatpush.bf16.msra.mxu2 %v1515_v39 }
 0x41d   :  { %v305_v62 = vadd.f32 %v304_v44, %v1888_v36 }
 0x41e   :  { %1506 = vmatmul.msk.bf16.vlgmr.msrb.gmra.mxu0 %vm106_vm1, %v399_v33 }
 0x421   :  { %v1659_v45 = vpop.eup %1658 }
 0x422   :  { %v398_v46 = vmul.f32 %v1659_v45, %v1649_v14  ;;  %v501_v47 = vpop.xlane.xlu1 %500 }
 0x423   :  { %1660 = vrcp.f32 %v501_v47 }
 0x424   :  { %v400_v48 = vpack.c.bf16 %v398_v46, %v398_v46  ;;  %v306_v49 = vpop.f32.mrf.mxu0 }
 0x426   :  { %1507 = vmatmul.msk.bf16.vlgmr.msrb.gmra.mxu1 %vm106_vm1, %v400_v48 }
 0x429   :  { %v1661_v50 = vpop.eup %1660 }
 0x42a   :  { %v507_v51 = vmul.f32 %v1661_v50, %v1651_v21  ;;  %v504_v53 = vpop.xlane.xlu0 %503 }
 0x42b   :  { %1662 = vrcp.f32 %v504_v53  ;;  %v35_v53 = vld [vmem:[%s2239_s2 + $0x1] ss:$0 sm:$0xff] }
 0x42c   :  { %v509_v52 = vpack.c.bf16 %v507_v51, %v507_v51  ;;  %1664 = vrcp.f32 %v1749_v13 }
 0x42e   :  { %1510 = vmatmul.msk.bf16.vlgmr.msra.gmra.mxu0 %vm106_vm1, %v509_v52 }
 0x431   :  { %v1663_v54 = vpop.eup %1662 }
 0x432   :  { %v508_v55 = vmul.f32 %v1663_v54, %v1653_v24  ;;  %v1665_v14 = vpop.eup %1664 }
 0x433   :  { %v570_v16 = vmul.f32 32.0, %v1665_v14  ;;  %vm574_vm3 = vweird.f32 %v1665_v14 }
 0x434   :  { %v510_v9 = vpack.c.bf16 %v508_v55, %v508_v55 }
 0x43a   :  { %v539_v56 = vpop.permute.xlu1 %538 }
 0x43b   :  { %v544_v57 = vsel %vm249_vm2, %v539_v56, 0 }
 0x43c   :  { %553 = vmatpush.bf16.msra.mxu1 %v544_v57 }
 0x43f   :  { %v325_v58 = vpop.f32.mrf.mxu1  ;;  %1511 = vmatmul.msk.bf16.vlgmr.msra.gmra.mxu1 %vm106_vm1, %v510_v9 }
 0x440   :  { %v326_v5 = vadd.f32 %v325_v58, %v1890_v38 }
 0x447   :  { %v327_v41 = vpop.f32.mrf.mxu1 }
 0x49b   :  { %v416_v59 = vpop.f32.mrf.mxu0 }
 0x49c   :  { %v439_v63 = vadd.f32 %v416_v59, %v305_v62  ;;  %v36_v59 = vld [vmem:[%s2239_s2 + $0x2] ss:$0 sm:$0xff] }
 0x4a3   :  { %v418_v60 = vpop.f32.mrf.mxu0  ;;  %v435_v61 = vpop.f32.mrf.mxu1 }
 0x4a4   :  { %v440_v20 = vadd.f32 %v435_v61, %v326_v5 }
 0x4ab   :  { %v437_v0 = vpop.f32.mrf.mxu1  ;;  %v531_v15 = vpop.f32.mrf.mxu0 }
 0x4ac   :  { %v559_v1 = vadd.f32 %v531_v15, %v439_v63  ;;  %v1535_v15 = vld [vmem:[%s2238_s1 + $0x70] sm:$0xf] }
 0x4ae   :  { %v561_v2 = vadd.f32 %v559_v1, %v1788_v6  ;;  %v571_v6 = vsub.f32 1.0, %v570_v16  ;;  %v1608_v1 = vld [vmem:[%s2238_s1 + $0x74] sm:$0xf0] }
 0x4b0   :  { %v563_v3 = vsel %vm67_vm0, %v561_v2, 0.0  ;;  %v572_v17 = vmul.f32 %v1665_v14, %v571_v6 }
 0x4b1   :  { %564 = vadd.xlane.f32.xlu2 %v563_v3  ;;  %v1531_v3 = vld [vmem:[%s2238_s1 + $0x60] sm:$0xf] }
 0x4b2   :  { %v573_v18 = vadd.f32 %v1665_v14, %v572_v17 }
 0x4b3   :  { %v533_v4 = vpop.f32.mrf.mxu0 }
 0x4b4   :  { %v1928_v19 = vsel %vm574_vm3, %v1665_v14, %v573_v18  ;;  %v1607_v4 = vld [vmem:[%s2238_s1 + $0x64] sm:$0xf0]  ;;  %v37_v14 = vld [vmem:[%s2239_s2 + $0x3] ss:$0 sm:$0xff] }
 0x4b5   :  { %v1532_v5 = vor.u32 %v1607_v4, %v1531_v3  ;;  %v39_v3 = vld [vmem:[%s2239_s2 + $0x5] ss:$0 sm:$0xff] }
 0x4bc   :  { %v555_v8 = vpop.f32.mrf.mxu1 }
 0x4bd   :  { %v560_v10 = vadd.f32 %v555_v8, %v440_v20  ;;  %v1527_v20 = vld [vmem:[%s2238_s1 + $0x50] sm:$0xf]  ;;  %v1606_v8 = vld [vmem:[%s2238_s1 + $0x54] sm:$0xf0] }
 0x4bf   :  { %v562_v11 = vadd.f32 %v560_v10, %v1793_v7  ;;  %v1528_v10 = vor.u32 %v1606_v8, %v1527_v20 }
 0x4c1   :  { %v566_v12 = vsel %vm67_vm0, %v562_v11, 0.0 }
 0x4c2   :  { %567 = vadd.xlane.f32.xlu1 %v566_v12  ;;  %v1605_v12 = vld [vmem:[%s2238_s1 + $0x44] sm:$0xf0] }
 0x4c4   :  { %v557_v36 = vpop.f32.mrf.mxu1 }
 0x524   :  { %v565_v38 = vpop.xlane.xlu2 %564 }
 0x525   :  { %v576_v21 = vmul.f32 %v1928_v19, %v565_v38 }
 0x527   :  { %v578_v22 = vsub.f32 %v561_v2, %v576_v21  ;;  %v1536_v2 = vor.u32 %v1608_v1, %v1535_v15 }
 0x529   :  { %v580_v23 = vmul.f32 %v578_v22, %v578_v22  ;;  %v590_v57 = vmul.f32 %v578_v22, %v35_v53  ;;  %683 = vmatpush.bf16.msra.mxu3 %v1536_v2  ;;  %v38_v22 = vld [vmem:[%s2239_s2 + $0x4] ss:$0 sm:$0xff] }
 0x52b   :  { %v582_v7 = vsel %vm67_vm0, %v580_v23, 0.0 }
 0x52c   :  { %583 = vadd.xlane.f32.xlu0 %v582_v7 }
 0x52d   :  { %684 = vmatpush.bf16.msra.mxu3 %v1532_v5 }
 0x531   :  { %685 = vmatpush.bf16.msra.mxu3 %v1528_v10 }
 0x535   :  { %v568_v24 = vpop.xlane.xlu1 %567 }
 0x536   :  { %v577_v25 = vmul.f32 %v1928_v19, %v568_v24 }
 0x538   :  { %v579_v26 = vsub.f32 %v562_v11, %v577_v25  ;;  %v1523_v11 = vld [vmem:[%s2238_s1 + $0x40] sm:$0xf] }
 0x539   :  { %v1524_v36 = vor.u32 %v1605_v12, %v1523_v11 }
 0x53a   :  { %v581_v27 = vmul.f32 %v579_v26, %v579_v26  ;;  %v591_v58 = vmul.f32 %v579_v26, %v35_v53 }
 0x53b   :  { %686 = vmatpush.bf16.msra.mxu3 %v1524_v36  ;;  %v40_v36 = vld [vmem:[%s2239_s2 + $0x6] ss:$0 sm:$0xff] }
 0x53c   :  { %v585_v28 = vsel %vm67_vm0, %v581_v27, 0.0 }
 0x53d   :  { %586 = vadd.xlane.f32.xlu0 %v585_v28 }
 0x59f   :  { %v584_v29 = vpop.xlane.xlu0 %583 }
 0x5a0   :  { %v588_v30 = vmul.f32 %v584_v29, %v1928_v19 }
 0x5a2   :  { %v592_v31 = vadd.f32 1e-05, %v588_v30 }
 0x5a4   :  { %1666 = vrsqrt.f32 %v592_v31  ;;  %vm600_vm5 = vweird.f32 %v592_v31 }
 0x5aa   :  { %v1667_v40 = vpop.eup %1666 }
 0x5ab   :  { %v595_v43 = vmul.f32 %v1667_v40, %v592_v31  ;;  %vm601_vm4 = vweird.f32 %v1667_v40 }
 0x5ac   :  { %vm602_vm6 = vmor %vm600_vm5, %vm601_vm4 }
 0x5ad   :  { %v596_v45 = vmul.f32 %v1667_v40, %v595_v43 }
 0x5af   :  { %v597_v47 = vmul.f32 0.5, %v596_v45  ;;  %v1611_v45 = vld [vmem:[%s2238_s1 + $0x94] sm:$0xf] }
 0x5b0   :  { %v587_v33 = vpop.xlane.xlu0 %586 }
 0x5b1   :  { %v589_v44 = vmul.f32 %v587_v33, %v1928_v19  ;;  %v598_v48 = vsub.f32 1.5, %v597_v47  ;;  %v1549_v33 = vld [vmem:[%s2238_s1 + $0x90] sm:$0xf]  ;;  %v1551_v47 = vld [vmem:[%s2238_s1 + $0x98] sm:$0xf0] }
 0x5b3   :  { %v593_v46 = vadd.f32 1e-05, %v589_v44  ;;  %v599_v51 = vmul.f32 %v1667_v40, %v598_v48  ;;  %v1612_v44 = vld [vmem:[%s2238_s1 + $0x94] sm:$0xf0]  ;;  %v1554_v48 = vor.u32 %v1611_v45, %v1551_v47 }
 0x5b5   :  { %1668 = vrsqrt.f32 %v593_v46  ;;  %v603_v55 = vsel %vm602_vm6, %v1667_v40, %v599_v51  ;;  %vm610_vm8 = vweird.f32 %v593_v46  ;;  %816 = vmatpush.bf16.msrb.mxu1 %v1554_v48  ;;  %v1610_v51 = vld [vmem:[%s2238_s1 + $0x84] sm:$0xf0] }
 0x5b6   :  { %v614_v41 = vmul.f32 %v603_v55, %v590_v57  ;;  %v1543_v55 = vld [vmem:[%s2238_s1 + $0x88] sm:$0xf0] }
 0x5b8   :  { %v616_v62 = vadd.f32 %v614_v41, %v36_v59 }
 0x5bb   :  { %v1669_v49 = vpop.eup %1668 }
 0x5bc   :  { %v605_v50 = vmul.f32 %v1669_v49, %v593_v46  ;;  %vm611_vm7 = vweird.f32 %v1669_v49  ;;  %v1550_v46 = vor.u32 %v1612_v44, %v1549_v33 }
 0x5bd   :  { %vm612_vm9 = vmor %vm610_vm8, %vm611_vm7 }
 0x5be   :  { %v606_v52 = vmul.f32 %v1669_v49, %v605_v50  ;;  %802 = vmatpush.bf16.msrb.mxu0 %v1550_v46  ;;  %v1541_v50 = vld [vmem:[%s2238_s1 + $0x80] sm:$0xf] }
 0x5c0   :  { %v607_v54 = vmul.f32 0.5, %v606_v52  ;;  %v1609_v52 = vld [vmem:[%s2238_s1 + $0x84] sm:$0xf] }
 0x5c2   :  { %v608_v56 = vsub.f32 1.5, %v607_v54  ;;  %v1542_v54 = vor.u32 %v1610_v51, %v1541_v50 }
 0x5c4   :  { %v609_v9 = vmul.f32 %v1669_v49, %v608_v56  ;;  %v1546_v56 = vor.u32 %v1609_v52, %v1543_v55  ;;  %803 = vmatpush.bf16.msrb.mxu0 %v1542_v54 }
 0x5c6   :  { %v613_v60 = vsel %vm612_vm9, %v1669_v49, %v609_v9  ;;  %817 = vmatpush.bf16.msrb.mxu1 %v1546_v56 }
 0x5c7   :  { %v615_v61 = vmul.f32 %v613_v60, %v591_v58 }
 0x5c9   :  { %v617_v63 = vadd.f32 %v615_v61, %v36_v59 }
 0x5cb   :  { %v618_v0 = vpack.c.bf16 %v617_v63, %v616_v62 }
 0x5cd   :  { %1520 = vmatmul.msk.bf16.vlgmr.msra.gmra.mxu2 %vm67_vm0, %v618_v0 }
 0x650   :  { %v643_v13 = vpop.f32.mrf.mxu2 }
 0x651   :  { %v644_v16 = vadd.f32 %v643_v13, %v37_v14 }
 0x653   :  { %v648_v18 = vmax.f32 %v644_v16, 0.0 }
 0x658   :  { %v645_v6 = vpop.f32.mrf.mxu2 }
 0x659   :  { %v646_v17 = vadd.f32 %v645_v6, %v37_v14 }
 0x65b   :  { %v649_v38 = vmax.f32 %v646_v17, 0.0 }
 0x65d   :  { %v650_v21 = vpack.c.bf16 %v649_v38, %v648_v18  ;;  %v2035_v18 = vld [vmem:[%s2239_s2 + $0x10] ss:$8 sm:$0x3] }
 0x65e   :  { %v769_v38 = vperm.slane %v2035_v18, 0 }
 0x65f   :  { %1537 = vmatmul.msk.bf16.vlgmr.msra.gmra.mxu3 %vm675_vm10, %v650_v21  ;;  %v770_v21 = vperm.slane %v2035_v18, 1 }
 0x6e2   :  { %v688_v23 = vpop.f32.mrf.mxu3 }
 0x6e3   :  { %v689_v7 = vadd.f32 %v688_v23, %v38_v22 }
 0x6e5   :  { %v693_v24 = vadd.f32 %v689_v7, %v616_v62 }
 0x6e7   :  { %v695_v25 = vsel %vm67_vm0, %v693_v24, 0.0 }
 0x6e8   :  { %696 = vadd.xlane.f32.xlu2 %v695_v25 }
 0x6ea   :  { %v690_v26 = vpop.f32.mrf.mxu3 }
 0x6eb   :  { %v691_v27 = vadd.f32 %v690_v26, %v38_v22 }
 0x6ed   :  { %v694_v28 = vadd.f32 %v691_v27, %v617_v63 }
 0x6ef   :  { %v698_v29 = vsel %vm67_vm0, %v694_v28, 0.0 }
 0x6f0   :  { %699 = vadd.xlane.f32.xlu0 %v698_v29 }
 0x75b   :  { %v697_v30 = vpop.xlane.xlu2 %696 }
 0x75c   :  { %v701_v31 = vmul.f32 %v697_v30, %v1928_v19 }
 0x75e   :  { %v703_v32 = vsub.f32 %v693_v24, %v701_v31 }
 0x760   :  { %v705_v34 = vmul.f32 %v703_v32, %v703_v32  ;;  %v715_v8 = vmul.f32 %v703_v32, %v39_v3 }
 0x762   :  { %v707_v35 = vsel %vm67_vm0, %v705_v34, 0.0 }
 0x763   :  { %v700_v37 = vpop.xlane.xlu0 %699  ;;  %708 = vadd.xlane.f32.xlu2 %v707_v35 }
 0x764   :  { %v702_v42 = vmul.f32 %v700_v37, %v1928_v19 }
 0x766   :  { %v704_v39 = vsub.f32 %v694_v28, %v702_v42 }
 0x768   :  { %v706_v40 = vmul.f32 %v704_v39, %v704_v39  ;;  %v716_v11 = vmul.f32 %v704_v39, %v39_v3 }
 0x76a   :  { %v710_v43 = vsel %vm67_vm0, %v706_v40, 0.0 }
 0x76b   :  { %711 = vadd.xlane.f32.xlu0 %v710_v43 }
 0x7d6   :  { %v709_v49 = vpop.xlane.xlu2 %708 }
 0x7d7   :  { %v713_v53 = vmul.f32 %v709_v49, %v1928_v19 }
 0x7d9   :  { %v717_v57 = vadd.f32 1e-05, %v713_v53 }
 0x7db   :  { %1670 = vrsqrt.f32 %v717_v57  ;;  %vm725_vm12 = vweird.f32 %v717_v57 }
 0x7de   :  { %v712_v9 = vpop.xlane.xlu0 %711 }
 0x7df   :  { %v714_v58 = vmul.f32 %v712_v9, %v1928_v19 }
 0x7e1   :  { %v1671_v41 = vpop.eup %1670  ;;  %v718_v59 = vadd.f32 1e-05, %v714_v58 }
 0x7e2   :  { %v720_v60 = vmul.f32 %v1671_v41, %v717_v57  ;;  %vm726_vm11 = vweird.f32 %v1671_v41 }
 0x7e3   :  { %1672 = vrsqrt.f32 %v718_v59  ;;  %vm727_vm13 = vmor %vm725_vm12, %vm726_vm11  ;;  %vm735_vm15 = vweird.f32 %v718_v59 }
 0x7e4   :  { %v721_v61 = vmul.f32 %v1671_v41, %v720_v60 }
 0x7e6   :  { %v722_v62 = vmul.f32 0.5, %v721_v61 }
 0x7e8   :  { %v723_v63 = vsub.f32 1.5, %v722_v62 }
 0x7e9   :  { %v1673_v0 = vpop.eup %1672 }
 0x7ea   :  { %v730_v15 = vmul.f32 %v1673_v0, %v718_v59  ;;  %v724_v1 = vmul.f32 %v1671_v41, %v723_v63  ;;  %vm736_vm14 = vweird.f32 %v1673_v0 }
 0x7eb   :  { %vm737_vm3 = vmor %vm735_vm15, %vm736_vm14 }
 0x7ec   :  { %v731_v2 = vmul.f32 %v1673_v0, %v730_v15  ;;  %v728_v5 = vsel %vm727_vm13, %v1671_v41, %v724_v1 }
 0x7ed   :  { %v739_v12 = vmul.f32 %v728_v5, %v715_v8 }
 0x7ee   :  { %v732_v4 = vmul.f32 0.5, %v731_v2 }
 0x7ef   :  { %v2024_v16 = vadd.f32 %v739_v12, %v40_v36 }
 0x7f0   :  { %v733_v20 = vsub.f32 1.5, %v732_v4 }
 0x7f2   :  { %v734_v10 = vmul.f32 %v1673_v0, %v733_v20 }
 0x7f4   :  { %v738_v13 = vsel %vm737_vm3, %v1673_v0, %v734_v10 }
 0x7f5   :  { %v740_v14 = vmul.f32 %v738_v13, %v716_v11 }
 0x7f7   :  { %v2026_v6 = vadd.f32 %v740_v14, %v40_v36 }
 0x7f9   :  { %v767_v17 = vpack.c.bf16 %v2026_v6, %v2024_v16 }
 0x7fb   :  { %1555 = vmatmul.msk.bf16.vlgmr.msrb.gmra.mxu0 %vm67_vm0, %v767_v17  ;;  %1556 = vmatmul.msk.bf16.vlgmr.msrb.gmra.mxu1 %vm67_vm0, %v767_v17 }
 0x878   :  { %v805_v22 = vpop.f32.mrf.mxu0  ;;  %v819_v23 = vpop.f32.mrf.mxu1 }
 0x879   :  { %v806_v7 = vadd.f32 %v805_v22, %v769_v38  ;;  %v2041_v24 = vadd.f32 %v819_v23, %v770_v21 }
 0x87b   :  { %v824_v25 = vpack.c.bf16 %v806_v7, %v806_v7 }
 0x87d   :  { %v827_v26 = vunpack.c.l.b16 %v824_v25 }
 0x87f   :  { %v2043_v27 = vpack.c.b16 %v827_v26, %v827_v26 }
 0x880   :  { %v807_v28 = vpop.f32.mrf.mxu0  ;;  %v2070_v49 = vpop.f32.mrf.mxu1 }
 0x881   :  { %v808_v29 = vadd.f32 %v807_v28, %v769_v38  ;;  %898 = vrot.lane.b32.xlu0 %v2043_v27, %s1740_s0  ;;  %900 = vrot.lane.b32.xlu2 %v2043_v27, %s1741_s26 }
 0x883   :  { %v825_v30 = vpack.c.bf16 %v808_v29, %v808_v29 }
 0x885   :  { %v851_v31 = vunpack.c.l.b16 %v825_v30 }
 0x887   :  { %v2049_v32 = vpack.c.b16 %v851_v31, %v851_v31 }
 0x889   :  { %923 = vrot.lane.b32.xlu1 %v2049_v32, %s1741_s26  ;;  %921 = vrot.lane.b32.xlu2 %v2049_v32, %s1740_s0 }
 0x891   :  { %829 = vrot.lane.b32.xlu2 %v2043_v27, %s1742_s27 }
 0x899   :  { %853 = vrot.lane.b32.xlu2 %v2049_v32, %s1742_s27 }
 0x8db   :  { %v901_v34 = vpop.permute.xlu2 %900 }
 0x8dc   :  { %v906_v35 = vsel %vm106_vm1, %v901_v34, 0 }
 0x8dd   :  { %915 = vmatpush.bf16.xpose.msra.mxu0 %v906_v35 }
 0x8e3   :  { %v922_v37 = vpop.permute.xlu2 %921 }
 0x8eb   :  { %v830_v42 = vpop.permute.xlu2 %829 }
 0x8ec   :  { %v835_v39 = vsel %vm106_vm1, %v830_v42, 0 }
 0x8ed   :  { %844 = vmatpush.bf16.xpose.msrb.mxu2 %v835_v39 }
 0x8f3   :  { %v899_v40 = vpop.permute.xlu0 %898  ;;  %v854_v43 = vpop.permute.xlu2 %853 }
 0x8f4   :  { %v859_v33 = vsel %vm106_vm1, %v854_v43, 0  ;;  %1557 = vmatmul.msk.bf16.vlgmr.msrb.gmra.mxu2 %vm106_vm1, %v824_v25  ;;  %1559 = vmatmul.msk.bf16.vlgmr.msra.gmra.mxu0 %vm106_vm1, %v899_v40 }
 0x8f5   :  { %868 = vmatpush.bf16.xpose.msrb.mxu3 %v859_v33 }
 0x8fb   :  { %v924_v44 = vpop.permute.xlu1 %923 }
 0x8fc   :  { %v929_v45 = vsel %vm106_vm1, %v924_v44, 0  ;;  %1558 = vmatmul.msk.bf16.vlgmr.msrb.gmra.mxu3 %vm106_vm1, %v825_v30 }
 0x8fd   :  { %938 = vmatpush.bf16.xpose.msra.mxu1 %v929_v45 }
 0x904   :  { %1560 = vmatmul.msk.bf16.vlgmr.msra.gmra.mxu1 %vm106_vm1, %v922_v37 }
 0x971   :  { %v917_v46 = vpop.f32.mrf.mxu0 }
 0x972   :  { %v944_v47 = vsel %vm106_vm1, %v917_v46, -inf }
 0x973   :  { %945 = vmax.xlane.f32.xlu0 %v944_v47 }
 0x977   :  { %v2068_v48 = vpop.f32.mrf.mxu2 }
 0x978   :  { %v874_v57 = vsel %vm106_vm1, %v2068_v48, -inf }
 0x979   :  { %v919_v50 = vpop.f32.mrf.mxu0 }
 0x97f   :  { %v848_v51 = vpop.f32.mrf.mxu2  ;;  %v2072_v52 = vpop.f32.mrf.mxu3 }
 0x980   :  { %v877_v8 = vsel %vm106_vm1, %v2072_v52, -inf }
 0x981   :  { %v940_v53 = vpop.f32.mrf.mxu1 }
 0x982   :  { %v947_v54 = vsel %vm106_vm1, %v940_v53, -inf }
 0x983   :  { %948 = vmax.xlane.f32.xlu1 %v947_v54 }
 0x987   :  { %989 = vrot.lane.b32.xlu0 %v2049_v32, %s1743_s28  ;;  %v872_v55 = vpop.f32.mrf.mxu3 }
 0x989   :  { %v942_v56 = vpop.f32.mrf.mxu1 }
 0x98f   :  { %1054 = vrot.lane.b32.xlu0 %v2043_v27, %s1745_s11 }
 0x99c   :  { %968 = vrot.lane.b32.xlu1 %v2043_v27, %s1743_s28 }
 0x9a4   :  { %1079 = vrot.lane.b32.xlu1 %v2049_v32, %s1744_s29 }
 0x9ac   :  { %1077 = vrot.lane.b32.xlu1 %v2049_v32, %s1745_s11 }
 0x9b4   :  { %1189 = vrot.lane.b32.xlu1 %v2049_v32, %s1746_s12 }
 0x9de   :  { %875 = vmax.xlane.f32.xlu1 %v874_v57 }
 0x9e6   :  { %v946_v9 = vpop.xlane.xlu0 %945 }
 0x9e7   :  { %v950_v58 = vsub.f32 %v917_v46, %v946_v9 }
 0x9e9   :  { %v952_v41 = vmul.f32 1.442695, %v950_v58 }
 0x9eb   :  { %1674 = vpow2.f32 %v952_v41 }
 0x9f1   :  { %v1675_v59 = vpop.eup %1674 }
 0x9f2   :  { %v956_v60 = vsel %vm106_vm1, %v1675_v59, 0.0 }
 0x9f3   :  { %957 = vadd.xlane.f32.xlu2 %v956_v60 }
 0x9f6   :  { %v949_v61 = vpop.xlane.xlu1 %948 }
 0x9f7   :  { %v951_v62 = vsub.f32 %v940_v53, %v949_v61 }
 0x9f9   :  { %v954_v63 = vmul.f32 1.442695, %v951_v62  ;;  %v990_v0 = vpop.permute.xlu0 %989  ;;  %v822_v62 = vadd.f32 %v2070_v49, %v770_v21 }
 0x9fa   :  { %v995_v15 = vsel %vm249_vm2, %v990_v0, 0 }
 0x9fb   :  { %1676 = vpow2.f32 %v954_v63  ;;  %1004 = vmatpush.bf16.msra.mxu3 %v995_v15  ;;  %v1053_v63 = vpack.c.bf16 %v822_v62, %v822_v62 }
 0x9fd   :  { %v1259_v0 = vunpack.c.l.b16 %v1053_v63 }
 0x9ff   :  { %v1260_v15 = vpack.c.b16 %v1259_v0, %v1259_v0 }
 0xa01   :  { %v1677_v1 = vpop.eup %1676  ;;  %v1055_v12 = vpop.permute.xlu0 %1054 }
 0xa02   :  { %v959_v2 = vsel %vm106_vm1, %v1677_v1, 0.0 }
 0xa03   :  { %960 = vadd.xlane.f32.xlu0 %v959_v2 }
 0xa0b   :  { %1056 = vrot.lane.b32.xlu2 %v2043_v27, %s1744_s29 }
 0xa0e   :  { %v969_v3 = vpop.permute.xlu1 %968 }
 0xa0f   :  { %v974_v4 = vsel %vm249_vm2, %v969_v3, 0 }
 0xa10   :  { %983 = vmatpush.bf16.msra.mxu2 %v974_v4 }
 0xa13   :  { %1187 = vrot.lane.b32.xlu2 %v2049_v32, %s1747_s13 }
 0xa16   :  { %v1080_v5 = vpop.permute.xlu1 %1079 }
 0xa17   :  { %v1085_v20 = vsel %vm106_vm1, %v1080_v5, 0  ;;  %1166 = vrot.lane.b32.xlu0 %v2043_v27, %s1746_s12 }
 0xa18   :  { %1094 = vmatpush.bf16.xpose.msrb.mxu3 %v1085_v20 }
 0xa1e   :  { %v1078_v38 = vpop.permute.xlu1 %1077 }
 0xa1f   :  { %1164 = vrot.lane.b32.xlu0 %v2043_v27, %s1747_s13  ;;  %s1750_s13 = smov [#allocation2]  }
 0xa26   :  { %v1190_v25 = vpop.permute.xlu1 %1189 }
 0xa27   :  { %v1195_v28 = vsel %vm106_vm1, %v1190_v25, 0 }
 0xa49   :  { %878 = vmax.xlane.f32.xlu0 %v877_v8 }
 0xa51   :  { %v876_v47 = vpop.xlane.xlu1 %875 }
 0xa52   :  { %v880_v50 = vsub.f32 %v2068_v48, %v876_v47 }
 0xa54   :  { %v882_v53 = vmul.f32 1.442695, %v880_v50 }
 0xa66   :  { %v958_v10 = vpop.xlane.xlu2 %957 }
 0xa67   :  { %1678 = vrcp.f32 %v958_v10 }
 0xa6d   :  { %v1679_v11 = vpop.eup %1678 }
 0xa6e   :  { %v964_v36 = vmul.f32 %v1679_v11, %v1675_v59  ;;  %v1057_v13 = vpop.permute.xlu2 %1056 }
 0xa6f   :  { %v1062_v14 = vsel %vm106_vm1, %v1057_v13, 0 }
 0xa70   :  { %v966_v17 = vpack.c.bf16 %v964_v36, %v964_v36  ;;  %1071 = vmatpush.bf16.xpose.msrb.mxu2 %v1062_v14 }
 0xa72   :  { %1561 = vmatmul.msk.bf16.vlgmr.msra.gmra.mxu2 %vm106_vm1, %v966_v17 }
 0xa76   :  { %v961_v22 = vpop.xlane.xlu0 %960  ;;  %v1188_v34 = vpop.permute.xlu2 %1187 }
 0xa77   :  { %1680 = vrcp.f32 %v961_v22 }
 0xa7d   :  { %v1681_v23 = vpop.eup %1680 }
 0xa7e   :  { %v965_v7 = vmul.f32 %v1681_v23, %v1677_v1  ;;  %v1052_v23 = vpack.c.bf16 %v2041_v24, %v2041_v24 }
 0xa80   :  { %v967_v26 = vpack.c.bf16 %v965_v7, %v965_v7 }
 0xa82   :  { %1562 = vmatmul.msk.bf16.vlgmr.msra.gmra.mxu3 %vm106_vm1, %v967_v26  ;;  %1565 = vmatmul.msk.bf16.vlgmr.msrb.gmra.mxu2 %vm106_vm1, %v1055_v12 }
 0xa83   :  { %1204 = vmatpush.bf16.xpose.msra.mxu3 %v1195_v28  ;;  %v1128_v28 = vsel %vm249_vm2, %v1052_v23, 0 }
 0xa89   :  { %v1167_v29 = vpop.permute.xlu0 %1166 }
 0xa8a   :  { %v1172_v30 = vsel %vm106_vm1, %v1167_v29, 0 }
 0xa8b   :  { %1181 = vmatpush.bf16.xpose.msra.mxu2 %v1172_v30 }
 0xa91   :  { %v1165_v31 = vpop.permute.xlu0 %1164 }
 0xa92   :  { %1566 = vmatmul.msk.bf16.vlgmr.msrb.gmra.mxu3 %vm106_vm1, %v1078_v38  ;;  %1569 = vmatmul.msk.bf16.vlgmr.msra.gmra.mxu2 %vm106_vm1, %v1165_v31 }
 0xaa2   :  { %1570 = vmatmul.msk.bf16.vlgmr.msra.gmra.mxu3 %vm106_vm1, %v1188_v34 }
 0xabc   :  { %v879_v35 = vpop.xlane.xlu0 %878 }
 0xabd   :  { %v881_v37 = vsub.f32 %v2072_v52, %v879_v35 }
 0xabf   :  { %v884_v42 = vmul.f32 1.442695, %v881_v37 }
 0xac1   :  { %1682 = vpow2.f32 %v884_v42  ;;  %v1147_v42 = vsel %vm249_vm2, %v1053_v63, 0 }
 0xac2   :  { %1684 = vpow2.f32 %v882_v53 }
 0xac7   :  { %v2114_v39 = vpop.eup %1682 }
 0xac8   :  { %v889_v40 = vsel %vm106_vm1, %v2114_v39, 0.0  ;;  %v1685_v9 = vpop.eup %1684 }
 0xac9   :  { %890 = vadd.xlane.f32.xlu0 %v889_v40  ;;  %v886_v59 = vsel %vm106_vm1, %v1685_v9, 0.0  ;;  %v1235_v40 = vunpack.c.l.b16 %v1052_v23 }
 0xaf5   :  { %v2118_v43 = vpop.f32.mrf.mxu2 }
 0xafd   :  { %v987_v33 = vpop.f32.mrf.mxu2 }
 0xb05   :  { %v2120_v44 = vpop.f32.mrf.mxu3  ;;  %v1073_v45 = vpop.f32.mrf.mxu2 }
 0xb06   :  { %v1100_v46 = vsel %vm106_vm1, %v1073_v45, -inf }
 0xb07   :  { %1101 = vmax.xlane.f32.xlu2 %v1100_v46 }
 0xb0d   :  { %v1008_v51 = vpop.f32.mrf.mxu3  ;;  %v1075_v52 = vpop.f32.mrf.mxu2 }
 0xb15   :  { %v1096_v54 = vpop.f32.mrf.mxu3  ;;  %v1183_v55 = vpop.f32.mrf.mxu2 }
 0xb16   :  { %v1103_v56 = vsel %vm106_vm1, %v1096_v54, -inf  ;;  %v1210_v57 = vsel %vm106_vm1, %v1183_v55, -inf }
 0xb17   :  { %1104 = vmax.xlane.f32.xlu1 %v1103_v56  ;;  %1211 = vmax.xlane.f32.xlu0 %v1210_v57 }
 0xb1d   :  { %v1098_v58 = vpop.f32.mrf.mxu3  ;;  %v1185_v41 = vpop.f32.mrf.mxu2 }
 0xb1f   :  { %887 = vadd.xlane.f32.xlu1 %v886_v59 }
 0xb25   :  { %v1206_v60 = vpop.f32.mrf.mxu3 }
 0xb26   :  { %v1213_v48 = vsel %vm106_vm1, %v1206_v60, -inf }
 0xb27   :  { %1214 = vmax.xlane.f32.xlu2 %v1213_v48 }
 0xb2d   :  { %v1208_v61 = vpop.f32.mrf.mxu3 }
 0xb38   :  { %1031 = vrot.lane.b32.xlu1 %v2049_v32, %s1748_s14 }
 0xb3c   :  { %v891_v4 = vpop.xlane.xlu0 %890 }
 0xb3f   :  { %1010 = vrot.lane.b32.xlu2 %v2043_v27, %s1748_s14  ;;  %s1464_s14 = sshll.u32 %s1750_s13, 4  ;;  %s1465_s14 = int_to_ptr.vmem [resolvable:$true] %s1464_s14 }
 0xb40   :  { %1261 = vrot.lane.b32.xlu1 %v1260_v15, %s1742_s27 }
 0xb7a   :  { %v1102_v1 = vpop.xlane.xlu2 %1101 }
 0xb7b   :  { %v1106_v2 = vsub.f32 %v1073_v45, %v1102_v1  ;;  %v1236_v45 = vpack.c.b16 %v1235_v40, %v1235_v40 }
 0xb7d   :  { %v1108_v3 = vmul.f32 1.442695, %v1106_v2 }
 0xb7f   :  { %1686 = vpow2.f32 %v1108_v3 }
 0xb85   :  { %v1687_v5 = vpop.eup %1686 }
 0xb86   :  { %v1112_v18 = vsel %vm106_vm1, %v1687_v5, 0.0 }
 0xb87   :  { %1113 = vadd.xlane.f32.xlu0 %v1112_v18 }
 0xb8a   :  { %v1105_v21 = vpop.xlane.xlu1 %1104  ;;  %v1212_v49 = vpop.xlane.xlu0 %1211 }
 0xb8b   :  { %v1107_v20 = vsub.f32 %v1096_v54, %v1105_v21  ;;  %v1216_v8 = vsub.f32 %v1183_v55, %v1212_v49 }
 0xb8d   :  { %v1110_v32 = vmul.f32 1.442695, %v1107_v20  ;;  %v1218_v10 = vmul.f32 1.442695, %v1216_v8 }
 0xb8f   :  { %1688 = vpow2.f32 %v1110_v32 }
 0xb90   :  { %1690 = vpow2.f32 %v1218_v10 }
 0xb92   :  { %v888_v27 = vpop.xlane.xlu1 %887 }
 0xb93   :  { %1692 = vrcp.f32 %v888_v27 }
 0xb95   :  { %v1689_v11 = vpop.eup %1688 }
 0xb96   :  { %v1115_v12 = vsel %vm106_vm1, %v1689_v11, 0.0  ;;  %v1691_v13 = vpop.eup %1690 }
 0xb97   :  { %1116 = vadd.xlane.f32.xlu0 %v1115_v12  ;;  %v1222_v22 = vsel %vm106_vm1, %v1691_v13, 0.0 }
 0xb99   :  { %v1693_v38 = vpop.eup %1692 }
 0xb9a   :  { %v1215_v36 = vpop.xlane.xlu2 %1214  ;;  %v894_v7 = vmul.f32 %v1693_v38, %v1685_v9 }
 0xb9b   :  { %v1217_v14 = vsub.f32 %v1206_v60, %v1215_v36 }
 0xb9c   :  { %v896_v30 = vpack.c.bf16 %v894_v7, %v894_v7 }
 0xb9d   :  { %v1220_v17 = vmul.f32 1.442695, %v1217_v14 }
 0xb9f   :  { %1694 = vpow2.f32 %v1220_v17  ;;  %1223 = vadd.xlane.f32.xlu0 %v1222_v22 }
 0xba0   :  { %1696 = vrcp.f32 %v891_v4 }
 0xba2   :  { %v1011_v25 = vpop.permute.xlu2 %1010 }
 0xba3   :  { %v1016_v26 = vsel %vm249_vm2, %v1011_v25, 0 }
 0xba4   :  { %1025 = vmatpush.bf16.msrb.mxu0 %v1016_v26 }
 0xba5   :  { %v1695_v29 = vpop.eup %1694 }
 0xba6   :  { %v1697_v31 = vpop.eup %1696  ;;  %v1225_v34 = vsel %vm106_vm1, %v1695_v29, 0.0 }
 0xba7   :  { %1226 = vadd.xlane.f32.xlu2 %v1225_v34  ;;  %1563 = vmatmul.msk.bf16.vlgmr.msrb.gmra.mxu0 %vm106_vm1, %v896_v30  ;;  %v895_v35 = vmul.f32 %v1697_v31, %v2114_v39  ;;  %v1614_v30 = vld [vmem:[%s2238_s1 + $0xb4] sm:$0xf0] }
 0xba8   :  { %1137 = vmatpush.bf16.msra.mxu0 %v1128_v28 }
 0xba9   :  { %v897_v33 = vpack.c.bf16 %v895_v35, %v895_v35  ;;  %v1575_v35 = vld [vmem:[%s2238_s1 + $0xa0] sm:$0xf] }
 0xbaa   :  { %v1032_v24 = vpop.permute.xlu1 %1031 }
 0xbab   :  { %v1037_v37 = vsel %vm249_vm2, %v1032_v24, 0  ;;  %v1613_v24 = vld [vmem:[%s2238_s1 + $0xa4] sm:$0xf0] }
 0xbac   :  { %1046 = vmatpush.bf16.msrb.mxu1 %v1037_v37 }
 0xbaf   :  { %1564 = vmatmul.msk.bf16.vlgmr.msrb.gmra.mxu1 %vm106_vm1, %v897_v33 }
 0xbb0   :  { %1156 = vmatpush.bf16.msra.mxu1 %v1147_v42  ;;  %v1576_v42 = vor.u32 %v1613_v24, %v1575_v35 }
 0xbb2   :  { %v1262_v46 = vpop.permute.xlu1 %1261 }
 0xbb3   :  { %v1267_v47 = vsel %vm249_vm2, %v1262_v46, 0  ;;  %1237 = vrot.lane.b32.xlu0 %v1236_v45, %s1742_s27 }
 0xbb4   :  { %1276 = vmatpush.bf16.msrb.mxu1 %v1267_v47 }
 0xbfa   :  { %v1114_v50 = vpop.xlane.xlu0 %1113 }
 0xbfb   :  { %1698 = vrcp.f32 %v1114_v50 }
 0xc01   :  { %v1699_v39 = vpop.eup %1698 }
 0xc02   :  { %v1120_v51 = vmul.f32 %v1699_v39, %v1687_v5 }
 0xc04   :  { %v1122_v52 = vpack.c.bf16 %v1120_v51, %v1120_v51 }
 0xc06   :  { %1567 = vmatmul.msk.bf16.vlgmr.msra.gmra.mxu0 %vm106_vm1, %v1122_v52 }
 0xc0a   :  { %v1117_v53 = vpop.xlane.xlu0 %1116 }
 0xc0b   :  { %1700 = vrcp.f32 %v1117_v53 }
 0xc11   :  { %v1701_v54 = vpop.eup %1700 }
 0xc12   :  { %v1121_v55 = vmul.f32 %v1701_v54, %v1689_v11  ;;  %v1224_v57 = vpop.xlane.xlu0 %1223 }
 0xc13   :  { %1702 = vrcp.f32 %v1224_v57 }
 0xc14   :  { %v1123_v56 = vpack.c.bf16 %v1121_v55, %v1121_v55 }
 0xc16   :  { %1568 = vmatmul.msk.bf16.vlgmr.msra.gmra.mxu1 %vm106_vm1, %v1123_v56 }
 0xc19   :  { %v1703_v58 = vpop.eup %1702 }
 0xc1a   :  { %v1227_v9 = vpop.xlane.xlu2 %1226  ;;  %v1230_v60 = vmul.f32 %v1703_v58, %v1691_v13 }
 0xc1b   :  { %1704 = vrcp.f32 %v1227_v9  ;;  %v761_v9 = vld [vmem:[%s2239_s2 + $0x11] ss:$0 sm:$0xff] }
 0xc1c   :  { %v1232_v0 = vpack.c.bf16 %v1230_v60, %v1230_v60 }
 0xc21   :  { %v1705_v41 = vpop.eup %1704 }
 0xc22   :  { %v1231_v59 = vmul.f32 %v1705_v41, %v1695_v29  ;;  %v1579_v29 = vld [vmem:[%s2238_s1 + $0xb0] sm:$0xf] }
 0xc23   :  { %v1580_v31 = vor.u32 %v1614_v30, %v1579_v29 }
 0xc24   :  { %v1233_v48 = vpack.c.bf16 %v1231_v59, %v1231_v59  ;;  %v1027_v61 = vpop.f32.mrf.mxu0 }
 0xc25   :  { %v1238_v62 = vpop.permute.xlu0 %1237  ;;  %v1028_v32 = vadd.f32 %v1027_v61, %v2118_v43  ;;  %1356 = vmatpush.bf16.msrb.mxu2 %v1580_v31 }
 0xc26   :  { %v1243_v63 = vsel %vm249_vm2, %v1238_v62, 0  ;;  %1572 = vmatmul.msk.bf16.vlgmr.msrb.gmra.mxu1 %vm106_vm1, %v1233_v48  ;;  %v762_v62 = vld [vmem:[%s2239_s2 + $0x12] ss:$0 sm:$0xff] }
 0xc27   :  { %1252 = vmatpush.bf16.msrb.mxu0 %v1243_v63 }
 0xc29   :  { %1357 = vmatpush.bf16.msrb.mxu2 %v1576_v42 }
 0xc2a   :  { %1571 = vmatmul.msk.bf16.vlgmr.msrb.gmra.mxu0 %vm106_vm1, %v1232_v0 }
 0xc2c   :  { %v1029_v15 = vpop.f32.mrf.mxu0  ;;  %v1048_v1 = vpop.f32.mrf.mxu1 }
 0xc2d   :  { %v1049_v21 = vadd.f32 %v1048_v1, %v2120_v44 }
 0xc34   :  { %v1050_v2 = vpop.f32.mrf.mxu1 }
 0xc83   :  { %v1139_v3 = vpop.f32.mrf.mxu0 }
 0xc84   :  { %v1162_v10 = vadd.f32 %v1139_v3, %v1028_v32  ;;  %v1596_v3 = vld [vmem:[%s2238_s1 + $0xf0] sm:$0xf]  ;;  %v1616_v32 = vld [vmem:[%s2238_s1 + $0xd4] sm:$0xf0] }
 0xc8b   :  { %v1141_v4 = vpop.f32.mrf.mxu0 }
 0xc8c   :  { %v1618_v4 = vld [vmem:[%s2238_s1 + $0xf4] sm:$0xf0] }
 0xc93   :  { %v1158_v5 = vpop.f32.mrf.mxu1 }
 0xc94   :  { %v1163_v49 = vadd.f32 %v1158_v5, %v1049_v21  ;;  %v1597_v5 = vor.u32 %v1618_v4, %v1596_v3  ;;  %v1617_v21 = vld [vmem:[%s2238_s1 + $0xe4] sm:$0xf0] }
 0xc96   :  { %1398 = vmatpush.bf16.msrb.mxu3 %v1597_v5 }
 0xc9b   :  { %v1160_v18 = vpop.f32.mrf.mxu1 }
 0xc9c   :  { %v1592_v18 = vld [vmem:[%s2238_s1 + $0xe0] sm:$0xf] }
 0xca3   :  { %v1278_v20 = vpop.f32.mrf.mxu1 }
 0xca4   :  { %v1283_v8 = vadd.f32 %v1278_v20, %v1163_v49  ;;  %v1593_v49 = vor.u32 %v1617_v21, %v1592_v18  ;;  %v1588_v20 = vld [vmem:[%s2238_s1 + $0xd0] sm:$0xf] }
 0xca6   :  { %v1285_v11 = vadd.f32 %v1283_v8, %v2026_v6  ;;  %1399 = vmatpush.bf16.msrb.mxu3 %v1593_v49  ;;  %v1589_v8 = vor.u32 %v1616_v32, %v1588_v20 }
 0xca7   :  { %v1254_v27 = vpop.f32.mrf.mxu0 }
 0xca8   :  { %v1282_v12 = vadd.f32 %v1254_v27, %v1162_v10  ;;  %v1289_v36 = vsel %vm67_vm0, %v1285_v11, 0.0  ;;  %v1584_v10 = vld [vmem:[%s2238_s1 + $0xc0] sm:$0xf] }
 0xca9   :  { %1290 = vadd.xlane.f32.xlu0 %v1289_v36  ;;  %v763_v36 = vld [vmem:[%s2239_s2 + $0x13] ss:$0 sm:$0xff] }
 0xcaa   :  { %v1284_v13 = vadd.f32 %v1282_v12, %v2024_v16  ;;  %1400 = vmatpush.bf16.msrb.mxu3 %v1589_v8 }
 0xcab   :  { %v1280_v14 = vpop.f32.mrf.mxu1 }
 0xcac   :  { %v1286_v17 = vsel %vm67_vm0, %v1284_v13, 0.0 }
 0xcad   :  { %1287 = vadd.xlane.f32.xlu1 %v1286_v17 }
 0xcaf   :  { %v1256_v44 = vpop.f32.mrf.mxu0 }
 0xd1c   :  { %v1291_v38 = vpop.xlane.xlu0 %1290 }
 0xd1d   :  { %v1293_v23 = vmul.f32 %v1291_v38, %v1928_v19 }
 0xd1f   :  { %v1295_v25 = vsub.f32 %v1285_v11, %v1293_v23  ;;  %v1615_v11 = vld [vmem:[%s2238_s1 + $0xc4] sm:$0xf0] }
 0xd20   :  { %v1288_v22 = vpop.xlane.xlu1 %1287  ;;  %v1585_v27 = vor.u32 %v1615_v11, %v1584_v10 }
 0xd21   :  { %v1292_v43 = vmul.f32 %v1288_v22, %v1928_v19  ;;  %v1297_v28 = vmul.f32 %v1295_v25, %v1295_v25  ;;  %v1307_v48 = vmul.f32 %v1295_v25, %v761_v9 }
 0xd22   :  { %1401 = vmatpush.bf16.msrb.mxu3 %v1585_v27 }
 0xd23   :  { %v1294_v7 = vsub.f32 %v1284_v13, %v1292_v43  ;;  %v1301_v16 = vsel %vm67_vm0, %v1297_v28, 0.0  ;;  %v764_v43 = vld [vmem:[%s2239_s2 + $0x14] ss:$0 sm:$0xff] }
 0xd25   :  { %v1296_v6 = vmul.f32 %v1294_v7, %v1294_v7  ;;  %v1306_v59 = vmul.f32 %v1294_v7, %v761_v9 }
 0xd27   :  { %v1298_v26 = vsel %vm67_vm0, %v1296_v6, 0.0 }
 0xd28   :  { %1299 = vadd.xlane.f32.xlu2 %v1298_v26 }
 0xd30   :  { %1302 = vadd.xlane.f32.xlu2 %v1301_v16 }
 0xd9b   :  { %v1300_v34 = vpop.xlane.xlu2 %1299 }
 0xd9c   :  { %v1304_v37 = vmul.f32 %v1300_v34, %v1928_v19 }
 0xd9e   :  { %v1308_v40 = vadd.f32 1e-05, %v1304_v37 }
 0xda0   :  { %1706 = vrsqrt.f32 %v1308_v40  ;;  %vm1316_vm2 = vweird.f32 %v1308_v40 }
 0xda3   :  { %v1303_v33 = vpop.xlane.xlu2 %1302 }
 0xda4   :  { %v1305_v45 = vmul.f32 %v1303_v33, %v1928_v19 }
 0xda6   :  { %v1707_v46 = vpop.eup %1706  ;;  %v1309_v47 = vadd.f32 1e-05, %v1305_v45 }
 0xda7   :  { %v1311_v50 = vmul.f32 %v1707_v46, %v1308_v40  ;;  %vm1317_vm1 = vweird.f32 %v1707_v46 }
 0xda8   :  { %1708 = vrsqrt.f32 %v1309_v47  ;;  %vm1318_vm4 = vmor %vm1316_vm2, %vm1317_vm1  ;;  %vm1326_vm6 = vweird.f32 %v1309_v47 }
 0xda9   :  { %v1312_v39 = vmul.f32 %v1707_v46, %v1311_v50 }
 0xdab   :  { %v1313_v51 = vmul.f32 0.5, %v1312_v39 }
 0xdad   :  { %v1314_v52 = vsub.f32 1.5, %v1313_v51 }
 0xdae   :  { %v1709_v53 = vpop.eup %1708 }
 0xdaf   :  { %v1321_v54 = vmul.f32 %v1709_v53, %v1309_v47  ;;  %v1315_v55 = vmul.f32 %v1707_v46, %v1314_v52  ;;  %vm1327_vm5 = vweird.f32 %v1709_v53 }
 0xdb0   :  { %vm1328_vm7 = vmor %vm1326_vm6, %vm1327_vm5 }
 0xdb1   :  { %v1322_v56 = vmul.f32 %v1709_v53, %v1321_v54  ;;  %v1319_v58 = vsel %vm1318_vm4, %v1707_v46, %v1315_v55 }
 0xdb2   :  { %v1330_v61 = vmul.f32 %v1319_v58, %v1306_v59 }
 0xdb3   :  { %v1323_v57 = vmul.f32 0.5, %v1322_v56 }
 0xdb4   :  { %v1332_v15 = vadd.f32 %v1330_v61, %v762_v62 }
 0xdb5   :  { %v1324_v41 = vsub.f32 1.5, %v1323_v57  ;;  %v765_v57 = vld [vmem:[%s2239_s2 + $0x15] ss:$0 sm:$0xff] }
 0xdb7   :  { %v1325_v60 = vmul.f32 %v1709_v53, %v1324_v41 }
 0xdb9   :  { %v1329_v63 = vsel %vm1328_vm7, %v1709_v53, %v1325_v60 }
 0xdba   :  { %v1331_v0 = vmul.f32 %v1329_v63, %v1307_v48 }
 0xdbc   :  { %v1333_v1 = vadd.f32 %v1331_v0, %v762_v62 }
 0xdbe   :  { %v1334_v2 = vpack.c.bf16 %v1333_v1, %v1332_v15 }
 0xdc0   :  { %1581 = vmatmul.msk.bf16.vlgmr.msrb.gmra.mxu2 %vm67_vm0, %v1334_v2 }
 0xe43   :  { %v1359_v12 = vpop.f32.mrf.mxu2 }
 0xe44   :  { %v1360_v13 = vadd.f32 %v1359_v12, %v763_v36 }
 0xe46   :  { %v1364_v44 = vmax.f32 %v1360_v13, 0.0 }
 0xe4b   :  { %v1361_v14 = vpop.f32.mrf.mxu2 }
 0xe4c   :  { %v1362_v17 = vadd.f32 %v1361_v14, %v763_v36 }
 0xe4e   :  { %v1365_v38 = vmax.f32 %v1362_v17, 0.0 }
 0xe50   :  { %v1366_v22 = vpack.c.bf16 %v1365_v38, %v1364_v44 }
 0xe52   :  { %1598 = vmatmul.msk.bf16.vlgmr.msrb.gmra.mxu3 %vm675_vm10, %v1366_v22 }
 0xed5   :  { %v1403_v23 = vpop.f32.mrf.mxu3 }
 0xed6   :  { %v1404_v7 = vadd.f32 %v1403_v23, %v764_v43 }
 0xed8   :  { %v1408_v6 = vadd.f32 %v1404_v7, %v1332_v15 }
 0xeda   :  { %v1410_v25 = vsel %vm67_vm0, %v1408_v6, 0.0 }
 0xedb   :  { %1411 = vadd.xlane.f32.xlu2 %v1410_v25 }
 0xedd   :  { %v1405_v26 = vpop.f32.mrf.mxu3 }
 0xede   :  { %v1406_v28 = vadd.f32 %v1405_v26, %v764_v43 }
 0xee0   :  { %v1409_v16 = vadd.f32 %v1406_v28, %v1333_v1 }
 0xee2   :  { %v1413_v29 = vsel %vm67_vm0, %v1409_v16, 0.0 }
 0xee3   :  { %1414 = vadd.xlane.f32.xlu1 %v1413_v29 }
 0xf4e   :  { %v1412_v30 = vpop.xlane.xlu2 %1411 }
 0xf4f   :  { %v1416_v31 = vmul.f32 %v1412_v30, %v1928_v19 }
 0xf51   :  { %v1418_v34 = vsub.f32 %v1408_v6, %v1416_v31 }
 0xf53   :  { %v1420_v35 = vmul.f32 %v1418_v34, %v1418_v34  ;;  %v1430_v60 = vmul.f32 %v1418_v34, %v765_v57 }
 0xf55   :  { %v1422_v24 = vsel %vm67_vm0, %v1420_v35, 0.0 }
 0xf56   :  { %v1415_v37 = vpop.xlane.xlu1 %1414  ;;  %1423 = vadd.xlane.f32.xlu2 %v1422_v24 }
 0xf57   :  { %v1417_v42 = vmul.f32 %v1415_v37, %v1928_v19 }
 0xf59   :  { %v1419_v40 = vsub.f32 %v1409_v16, %v1417_v42 }
 0xf5b   :  { %v1421_v33 = vmul.f32 %v1419_v40, %v1419_v40  ;;  %v1431_v2 = vmul.f32 %v1419_v40, %v765_v57 }
 0xf5d   :  { %v1425_v45 = vsel %vm67_vm0, %v1421_v33, 0.0 }
 0xf5e   :  { %1426 = vadd.xlane.f32.xlu1 %v1425_v45 }
 0xfc9   :  { %v1424_v46 = vpop.xlane.xlu2 %1423 }
 0xfca   :  { %v1428_v47 = vmul.f32 %v1424_v46, %v1928_v19 }
 0xfcc   :  { %v1432_v50 = vadd.f32 1e-05, %v1428_v47 }
 0xfce   :  { %1710 = vrsqrt.f32 %v1432_v50  ;;  %vm1440_vm9 = vweird.f32 %v1432_v50 }
 0xfd1   :  { %v1427_v39 = vpop.xlane.xlu1 %1426 }
 0xfd2   :  { %v1429_v51 = vmul.f32 %v1427_v39, %v1928_v19  ;;  %v766_v19 = vld [vmem:[%s2239_s2 + $0x16] ss:$0 sm:$0xff]  ;;  %s1751_s2 = smov 128  }
 0xfd4   :  { %v1711_v52 = vpop.eup %1710  ;;  %v1433_v53 = vadd.f32 1e-05, %v1429_v51 }
 0xfd5   :  { %v1435_v54 = vmul.f32 %v1711_v52, %v1432_v50  ;;  %vm1441_vm8 = vweird.f32 %v1711_v52 }
 0xfd6   :  { %1712 = vrsqrt.f32 %v1433_v53  ;;  %vm1442_vm10 = vmor %vm1440_vm9, %vm1441_vm8  ;;  %vm1450_vm12 = vweird.f32 %v1433_v53 }
 0xfd7   :  { %v1436_v55 = vmul.f32 %v1711_v52, %v1435_v54 }
 0xfd9   :  { %v1437_v56 = vmul.f32 0.5, %v1436_v55 }
 0xfdb   :  { %v1438_v9 = vsub.f32 1.5, %v1437_v56 }
 0xfdc   :  { %v1713_v58 = vpop.eup %1712 }
 0xfdd   :  { %v1439_v41 = vmul.f32 %v1711_v52, %v1438_v9  ;;  %v1445_v59 = vmul.f32 %v1713_v58, %v1433_v53  ;;  %vm1451_vm11 = vweird.f32 %v1713_v58 }
 0xfde   :  { %vm1452_vm13 = vmor %vm1450_vm12, %vm1451_vm11 }
 0xfdf   :  { %v1443_v48 = vsel %vm1442_vm10, %v1711_v52, %v1439_v41  ;;  %v1446_v61 = vmul.f32 %v1713_v58, %v1445_v59 }
 0xfe0   :  { %v1454_v62 = vmul.f32 %v1443_v48, %v1430_v60 }
 0xfe1   :  { %v1447_v63 = vmul.f32 0.5, %v1446_v61 }
 0xfe2   :  { %v1456_v0 = vadd.f32 %v1454_v62, %v766_v19 }
 0xfe3   :  { %v1448_v15 = vsub.f32 1.5, %v1447_v63 }
 0xfe4   :  { %1458 = vst.msk [vmem:[#allocation2] sm:$0xff] %vm67_vm0, %v1456_v0 }
 0xfe5   :  { %v1449_v1 = vmul.f32 %v1713_v58, %v1448_v15 }
 0xfe7   :  { %v1453_v3 = vsel %vm1452_vm13, %v1713_v58, %v1449_v1 }
 0xfe8   :  { %v1455_v4 = vmul.f32 %v1453_v3, %v1431_v2 }
 0xfea   :  { %v1457_v5 = vadd.f32 %v1455_v4, %v766_v19 }
 0xfec   :  { %1459 = vst.msk [vmem:[#allocation2 + $0x8] sm:$0xff] %vm67_vm0, %v1457_v5 }
 0xfed   :  { %1472 = dma.vmem_to_hbm [thread:$0]  %s1465_s14, 256, %s1467_s10, [#allocation3], %s1751_s2, %s1751_s2, %s1752_s15  }
 0xfee   :  { %1738 = dma.done.wait [#allocation3], 256  }
 0xfef   :  { %1739 = vsyncadd [#allocation3], 4294967040 }
 0xff0   :  { %1477 = vsyncpa [#allocation3], 1 }

</bundles_post_ra>
